<compile_context>
chip_gen: v6e
topology: v6e:2x2x1
jax: 0.10.0
libtpu: 0.0.40
codegen_flags: <defaults>
</compile_context>

<pallas_src>
import jax
import jax.numpy as jnp
import numpy as np
from jax import lax
from jax.experimental import pallas as pl
from jax.experimental.pallas import tpu as pltpu


def _round_up(x, m):
    return ((x + m - 1) // m) * m


# --------------------------------------------------------------------------
# Sizing helpers (VMEM-budget driven, generation-aware caps).
# --------------------------------------------------------------------------
def _choose_t_chunk(S, bb, hp, in_dim, *, cap=64, budget_bytes=24 << 20):
    per_t = bb * (2 * in_dim * 2          # x block, double-buffered, bf16
                  + 2 * hp * 2            # out block, double-buffered, bf16
                  + 2 * 4 * hp * 4)       # gx scratch, two pipeline slots, f32
    return int(max(1, min(cap, S, budget_bytes // per_t)))


def _layer_vmem_bytes(rows, bb, hp, in_dim, store_full):
    weights = in_dim * 4 * hp * 2 + hp * 4 * hp * 2 + 4 * hp * 4   # Buffered(1)
    x_b = 2 * rows * in_dim * 2
    out_rows = rows if store_full else bb
    out_b = 2 * out_rows * hp * 2
    scratch = bb * hp * 2 + bb * hp * 4 + 2 * rows * 4 * hp * 4
    return weights + x_b + out_b + scratch


# --------------------------------------------------------------------------
# Pallas kernel: one LSTM layer.
# grid = (batch_blocks, n_chunks + 1); the +1 step drains the gx pipeline.
# --------------------------------------------------------------------------
def _make_lstm_kernel(t_chunk, n_chunks, store_full, s_real):
    T = int(t_chunk)

    def kernel(x_ref, wih_ref, whh_ref, b_ref, out_ref, h_ref, c_ref, gx_ref):
        step = pl.program_id(1)                      # time-chunk axis
        BB, Hp = h_ref.shape

        @pl.when(step == 0)
        def _init():
            h_ref[...] = jnp.zeros_like(h_ref)
            c_ref[...] = jnp.zeros_like(c_ref)

        # ---- phase 1: recurrence over the projection produced at step-1 -----
        @pl.when(step > 0)
        def _recurrence():
            chunk = step - 1
            gx_prev = gx_ref.at[lax.rem(chunk, 2)]   # slot written last step

            def body(t, carry):
                h_b, c = carry                       # h bf16 (BB,Hp), c f32 (BB,Hp)
                r = pl.multiple_of(t * BB, BB)
                gates = gx_prev[pl.ds(r, BB), :] + jnp.dot(
                    h_b, whh_ref[...], preferred_element_type=jnp.float32)
                i = jax.nn.sigmoid(gates[:, 0 * Hp:1 * Hp])
                f = jax.nn.sigmoid(gates[:, 1 * Hp:2 * Hp])
                g = jnp.tanh(gates[:, 2 * Hp:3 * Hp])
                o = jax.nn.sigmoid(gates[:, 3 * Hp:4 * Hp])
                c_new = f * c + i * g
                # Cast once; reused for the store AND the next step's matmul.
                h_new = (o * jnp.tanh(c_new)).astype(jnp.bfloat16)
                if store_full:
                    out_ref[pl.ds(r, BB), :] = h_new
                else:
                    # Final layer: only the real last timestep is consumed.
                    @pl.when(chunk * T + t == s_real - 1)
                    def _():
                        out_ref[...] = h_new
                return h_new, c_new

            h_b, c = lax.fori_loop(0, T, body, (h_ref[...], c_ref[...]),
                                   unroll=min(T, 8))
            h_ref[...] = h_b
            c_ref[...] = c

        # ---- phase 2: hoisted input projection for the *current* chunk -------
        @pl.when(step < n_chunks)
        def _project():
            cur_slot = lax.rem(step, 2)
            gx_ref[cur_slot] = (
                jnp.dot(x_ref[...], wih_ref[...],
                        preferred_element_type=jnp.float32) + b_ref[...])

    return kernel


def lstm_layer_pallas(x, wih_t, whh_t, bias, *, n_chunks, t_chunk, bb, hp,
                      store_full, s_real, vmem_limit):
    """x: (NBB, Sp*BB, in) bf16; wih_t: (in, 4Hp) bf16; whh_t: (Hp, 4Hp) bf16;
    bias: (1, 4Hp) f32.  Returns (NBB, Sp*BB, Hp) bf16 if store_full else
    (NBB, BB, Hp) bf16 (hidden state at the real last timestep)."""
    nbb, rows_total, in_dim = x.shape
    rows = t_chunk * bb
    kernel = _make_lstm_kernel(t_chunk, n_chunks, store_full, s_real)

    if store_full:
        out_shape = jax.ShapeDtypeStruct((nbb, rows_total, hp), jnp.bfloat16)
        out_spec = pl.BlockSpec((None, rows, hp),
                                lambda j, s: (j, jnp.maximum(s - 1, 0), 0))
    else:
        out_shape = jax.ShapeDtypeStruct((nbb, bb, hp), jnp.bfloat16)
        out_spec = pl.BlockSpec((None, bb, hp), lambda j, s: (j, 0, 0))

    def resident(shape):     # constant-index weight block: single buffered
        return pl.BlockSpec(shape, lambda j, s: (0, 0),
                            pipeline_mode=pl.Buffered(1))

    return pl.pallas_call(
        kernel,
        out_shape=out_shape,
        grid_spec=pltpu.PrefetchScalarGridSpec(
            num_scalar_prefetch=0,
            grid=(nbb, n_chunks + 1),            # +1 drain step for gx pipeline
            in_specs=[
                pl.BlockSpec((None, rows, in_dim),
                             lambda j, s: (j, jnp.minimum(s, n_chunks - 1), 0)),
                resident((in_dim, 4 * hp)),
                resident((hp, 4 * hp)),
                resident((1, 4 * hp)),
            ],
            out_specs=out_spec,
            scratch_shapes=[
                pltpu.VMEM((bb, hp), jnp.bfloat16),          # h state (bf16)
                pltpu.VMEM((bb, hp), jnp.float32),           # c state (f32)
                pltpu.VMEM((2, rows, 4 * hp), jnp.float32),  # gx double buffer
            ],
        ),
        compiler_params=pltpu.CompilerParams(
            dimension_semantics=("parallel", "arbitrary"),
            vmem_limit_bytes=vmem_limit),
    )(x, wih_t, whh_t, bias)


# --------------------------------------------------------------------------
# Pallas kernel: final Linear(hidden -> 1) on the last-timestep hidden state.
# --------------------------------------------------------------------------
def fc_kernel(x_ref, w_ref, b_ref, o_ref):
    o_ref[...] = (jnp.dot(x_ref[...], w_ref[...],
                          preferred_element_type=jnp.float32) + b_ref[...])


def fc_pallas(x, w_t, b):
    bp, hp = x.shape
    return pl.pallas_call(
        fc_kernel,
        out_shape=jax.ShapeDtypeStruct((bp, 1), jnp.float32),
        in_specs=[
            pl.BlockSpec((bp, hp), lambda: (0, 0)),
            pl.BlockSpec((hp, 1), lambda: (0, 0)),
            pl.BlockSpec((1, 1), lambda: (0, 0)),
        ],
        out_specs=pl.BlockSpec((bp, 1), lambda: (0, 0)),
    )(x, w_t, b)


# --------------------------------------------------------------------------
# Weight preparation: pad hidden per-gate to Hp, transpose, cast bf16.
# --------------------------------------------------------------------------
def _prep_lstm_weights(w_ih, w_hh, b_ih, b_hh, H, Hp, in_pad):
    def pad_gate_rows(w):                       # (4H, in) -> (4Hp, in), gate-wise
        w4 = w.reshape(4, H, w.shape[1])
        w4 = jnp.pad(w4, ((0, 0), (0, Hp - H), (0, 0)))
        return w4.reshape(4 * Hp, w.shape[1])

    wih = pad_gate_rows(w_ih)
    if in_pad > wih.shape[1]:
        wih = jnp.pad(wih, ((0, 0), (0, in_pad - wih.shape[1])))
    whh = pad_gate_rows(w_hh)
    whh = jnp.pad(whh, ((0, 0), (0, Hp - H)))
    b = (b_ih + b_hh).reshape(4, H)
    b = jnp.pad(b, ((0, 0), (0, Hp - H))).reshape(1, 4 * Hp)
    return (wih.T.astype(jnp.bfloat16),
            whh.T.astype(jnp.bfloat16),
            b.astype(jnp.float32))


# --------------------------------------------------------------------------
# Full RNN forward: stacked LSTM (batch_first) + fc on the last timestep.
# --------------------------------------------------------------------------
def rnn_forward(x_bsi, params, hidden_size):
    B, S, I = x_bsi.shape
    num_layers = len(params["lstm"])
    Hp = _round_up(hidden_size, 128)

    # Batch blocks: one per TensorCore when the batch is large enough (v7x has
    # two TCs).  BB is a multiple of 16 -> full packed bf16 sublane tiles.
    NBB = 2 if B > 16 else 1
    BB = _round_up(pl.cdiv(B, NBB), 16)
    Bp = NBB * BB

    in_dim_max = max(I, Hp)
    t_chunk = _choose_t_chunk(S, BB, Hp, in_dim_max)
    n_chunks = pl.cdiv(S, t_chunk)
    Sp = n_chunks * t_chunk         # zero-pad time; later steps never affect earlier
    rows = t_chunk * BB

    vmem_limit = int(min(max(2 * _layer_vmem_bytes(rows, BB, Hp, in_dim_max, True),
                             32 << 20), 64 << 20))

    # (B, S, I) -> (NBB, Sp*BB, I): time-major inside each batch block, bf16.
    x = jnp.transpose(x_bsi, (1, 0, 2)).astype(jnp.float32)        # (S, B, I)
    x = jnp.pad(x, ((0, Sp - S), (0, Bp - B), (0, 0)))             # (Sp, Bp, I)
    x = x.reshape(Sp, NBB, BB, I).transpose(1, 0, 2, 3)            # (NBB, Sp, BB, I)
    h = x.reshape(NBB, Sp * BB, I).astype(jnp.bfloat16)

    for layer, (w_ih, w_hh, b_ih, b_hh) in enumerate(params["lstm"]):
        in_dim = h.shape[2]
        last_layer = layer == num_layers - 1
        wih_t, whh_t, bias = _prep_lstm_weights(
            w_ih, w_hh, b_ih, b_hh, hidden_size, Hp, in_dim)
        h = lstm_layer_pallas(h, wih_t, whh_t, bias,
                              n_chunks=n_chunks, t_chunk=t_chunk, bb=BB, hp=Hp,
                              store_full=not last_layer, s_real=S,
                              vmem_limit=vmem_limit)

    last = h.reshape(Bp, Hp)                       # h at out[:, -1, :], padded
    fc_w = jnp.pad(params["fc_w"], ((0, 0), (0, Hp - hidden_size)))
    out = fc_pallas(last,
                    fc_w.T.astype(jnp.bfloat16),
                    params["fc_b"].reshape(1, 1).astype(jnp.float32))
    return out[:B]                                 # (B, 1)


# --------------------------------------------------------------------------
# Pure-JAX f32 reference (PyTorch-equivalent math) for a correctness check.
# --------------------------------------------------------------------------
def rnn_reference(x_bsi, params):
    B = x_bsi.shape[0]
    seq = jnp.transpose(x_bsi, (1, 0, 2)).astype(jnp.float32)
    for (w_ih, w_hh, b_ih, b_hh) in params["lstm"]:
        H = w_hh.shape[1]
        h = jnp.zeros((B, H), jnp.float32)
        c = jnp.zeros((B, H), jnp.float32)
        outs = []
        for t in range(seq.shape[0]):
            gates = seq[t] @ w_ih.T + h @ w_hh.T + b_ih + b_hh
            i = jax.nn.sigmoid(gates[:, 0:H])
            f = jax.nn.sigmoid(gates[:, H:2 * H])
            g = jnp.tanh(gates[:, 2 * H:3 * H])
            o = jax.nn.sigmoid(gates[:, 3 * H:4 * H])
            c = f * c + i * g
            h = o * jnp.tanh(c)
            outs.append(h)
        seq = jnp.stack(outs, axis=0)
    last = seq[-1]
    return last @ params["fc_w"].T + params["fc_b"]


def init_params(key, input_size, hidden_size, num_layers):
    params = {"lstm": []}
    k = 1.0 / np.sqrt(hidden_size)
    for layer in range(num_layers):
        in_sz = input_size if layer == 0 else hidden_size
        key, k1, k2, k3, k4 = jax.random.split(key, 5)
        w_ih = jax.random.uniform(k1, (4 * hidden_size, in_sz), jnp.float32, -k, k)
        w_hh = jax.random.uniform(k2, (4 * hidden_size, hidden_size), jnp.float32, -k, k)
        b_ih = jax.random.uniform(k3, (4 * hidden_size,), jnp.float32, -k, k)
        b_hh = jax.random.uniform(k4, (4 * hidden_size,), jnp.float32, -k, k)
        params["lstm"].append((w_ih, w_hh, b_ih, b_hh))
    key, k5, k6 = jax.random.split(key, 3)
    params["fc_w"] = jax.random.uniform(k5, (1, hidden_size), jnp.float32, -k, k)
    params["fc_b"] = jax.random.uniform(k6, (1,), jnp.float32, -k, k)
    return params


if __name__ == "__main__":
    batch, seq_len = 2, 8
    input_size, hidden_size, num_layers = 4, 32, 2

    key = jax.random.PRNGKey(0)
    key, kx, kp = jax.random.split(key, 3)
    x = jax.random.normal(kx, (batch, seq_len, input_size), jnp.float32)
    params = init_params(kp, input_size, hidden_size, num_layers)

    out = rnn_forward(x, params, hidden_size)
    out = jax.block_until_ready(out)

    ref = rnn_reference(x, params)
    # bf16 matmul inputs / bf16 carried h (f32 accumulation, f32 c) -> loosened
    # tolerance vs the f32 reference.
    np.testing.assert_allclose(np.asarray(out, dtype=np.float32),
                               np.asarray(ref), rtol=5e-2, atol=5e-2)
    assert out.shape == (batch, 1)

    print("KERNEL_OK")
</pallas_src>

<mosaic_0001>
module attributes {stable_mosaic.version = 11 : i64} {
  func.func @kernel(%arg0: i32, %arg1: i32, %arg2: memref<1x128x4xbf16, #tpu.memory_space<vmem>>, %arg3: memref<4x512xbf16, #tpu.memory_space<vmem>>, %arg4: memref<128x512xbf16, #tpu.memory_space<vmem>>, %arg5: memref<1x512xf32, #tpu.memory_space<vmem>>, %arg6: memref<1x128x128xbf16, #tpu.memory_space<vmem>>, %arg7: memref<16x128xbf16, #tpu.memory_space<vmem>>, %arg8: memref<16x128xf32, #tpu.memory_space<vmem>>, %arg9: memref<2x128x512xf32, #tpu.memory_space<vmem>>) attributes {dimension_semantics = [#tpu.dimension_semantics<parallel>, #tpu.dimension_semantics<arbitrary>], iteration_bounds = array<i64: 1, 2>, scalar_prefetch = 0 : i64, scratch_operands = 3 : i64, tpu.core_type = #tpu.core_type<tc>, window_params = [{transform_indices = @transform_0, window_bounds = array<i64: 1, 128, 4>}, {pipeline_mode = #tpu.pipeline_mode<synchronous>, transform_indices = @transform_1, window_bounds = array<i64: 4, 512>}, {pipeline_mode = #tpu.pipeline_mode<synchronous>, transform_indices = @transform_2, window_bounds = array<i64: 128, 512>}, {pipeline_mode = #tpu.pipeline_mode<synchronous>, transform_indices = @transform_3, window_bounds = array<i64: 1, 512>}, {transform_indices = @transform_4, window_bounds = array<i64: 1, 128, 128>}]} {
    %c0_i32 = arith.constant 0 : i32
    %0 = arith.cmpi eq, %arg1, %c0_i32 : i32
    %1 = arith.extui %0 : i1 to i32
    %c0_i32_0 = arith.constant 0 : i32
    %2 = arith.cmpi ne, %1, %c0_i32_0 : i32
    scf.if %2 {
      %cst = arith.constant 0.000000e+00 : bf16
      %9 = vector.broadcast %cst : bf16 to vector<16x128xbf16>
      %c0 = arith.constant 0 : index
      %c0_4 = arith.constant 0 : index
      %10 = vector.load %arg7[%c0, %c0_4] : memref<16x128xbf16, #tpu.memory_space<vmem>>, vector<16x128xbf16>
      tpu.vector_store %arg7[%c0, %c0_4], %9 {strides = array<i32>} : memref<16x128xbf16, #tpu.memory_space<vmem>>, vector<16x128xbf16>,
      %cst_5 = arith.constant 0.000000e+00 : f32
      %11 = vector.broadcast %cst_5 : f32 to vector<16x128xf32>
      %c0_6 = arith.constant 0 : index
      %c0_7 = arith.constant 0 : index
      %12 = vector.load %arg8[%c0_6, %c0_7] : memref<16x128xf32, #tpu.memory_space<vmem>>, vector<16x128xf32>
      tpu.vector_store %arg8[%c0_6, %c0_7], %11 {strides = array<i32>} : memref<16x128xf32, #tpu.memory_space<vmem>>, vector<16x128xf32>,
    } else {
    }
    %c0_i32_1 = arith.constant 0 : i32
    %3 = arith.cmpi sgt, %arg1, %c0_i32_1 : i32
    %4 = arith.extui %3 : i1 to i32
    %c0_i32_2 = arith.constant 0 : i32
    %5 = arith.cmpi ne, %4, %c0_i32_2 : i32
    scf.if %5 {
      %c1_i32_4 = arith.constant 1 : i32
      %9 = arith.subi %arg1, %c1_i32_4 : i32
      %c2_i32 = arith.constant 2 : i32
      %10 = arith.remsi %9, %c2_i32 : i32
      %c0 = arith.constant 0 : index
      %c0_5 = arith.constant 0 : index
      %11 = vector.load %arg7[%c0, %c0_5] : memref<16x128xbf16, #tpu.memory_space<vmem>>, vector<16x128xbf16>
      %c0_6 = arith.constant 0 : index
      %c0_7 = arith.constant 0 : index
      %12 = vector.load %arg8[%c0_6, %c0_7] : memref<16x128xf32, #tpu.memory_space<vmem>>, vector<16x128xf32>
      %c0_i32_8 = arith.constant 0 : i32
      %c16_i32 = arith.constant 16 : i32
      %13 = arith.muli %c0_i32_8, %c16_i32 : i32
      %14 = tpu.assume_multiple %13, 16 : i32
      %c0_i32_9 = arith.constant 0 : i32
      %c0_i32_10 = arith.constant 0 : i32
      %15 = tpu.memref_slice %arg9[%10, %c0_i32_9, %c0_i32_10] : memref<2x128x512xf32, #tpu.memory_space<vmem>> -> memref<1x128x512xf32, #tpu.memory_space<vmem>>
      %16 = tpu.memref_squeeze %15 : memref<1x128x512xf32, #tpu.memory_space<vmem>> -> memref<128x512xf32, #tpu.memory_space<vmem>>
      %17 = arith.index_cast %14 : i32 to index
      %c0_11 = arith.constant 0 : index
      %18 = vector.load %16[%17, %c0_11] : memref<128x512xf32, #tpu.memory_space<vmem>>, vector<16x512xf32>
      %c0_12 = arith.constant 0 : index
      %c0_13 = arith.constant 0 : index
      %19 = vector.load %arg4[%c0_12, %c0_13] : memref<128x512xbf16, #tpu.memory_space<vmem>>, vector<128x512xbf16>
      %cst = arith.constant dense<0.000000e+00> : vector<16x512xf32>
      %20 = tpu.matmul %11, %19, %cst {dimension_numbers = #tpu.dot_dimension_numbers<[1], [0], [0], [1], [0, 0, 1, 1], [], []>} : vector<16x128xbf16>, vector<128x512xbf16>, vector<16x512xf32> -> vector<16x512xf32>
      %21 = arith.addf %18, %20 : vector<16x512xf32>
      %22 = vector.extract_strided_slice %21 {offsets = [0, 0], sizes = [16, 128], strides = [1, 1]} : vector<16x512xf32> to vector<16x128xf32>
      %23 = arith.negf %22 : vector<16x128xf32>
      %24 = math.exp %23 : vector<16x128xf32>
      %cst_14 = arith.constant 1.000000e+00 : f32
      %25 = vector.broadcast %cst_14 : f32 to vector<16x128xf32>
      %26 = arith.addf %25, %24 : vector<16x128xf32>
      %27 = arith.divf %25, %26 : vector<16x128xf32>
      %28 = vector.extract_strided_slice %21 {offsets = [0, 128], sizes = [16, 128], strides = [1, 1]} : vector<16x512xf32> to vector<16x128xf32>
      %29 = arith.negf %28 : vector<16x128xf32>
      %30 = math.exp %29 : vector<16x128xf32>
      %cst_15 = arith.constant 1.000000e+00 : f32
      %31 = vector.broadcast %cst_15 : f32 to vector<16x128xf32>
      %32 = arith.addf %31, %30 : vector<16x128xf32>
      %33 = arith.divf %31, %32 : vector<16x128xf32>
      %34 = vector.extract_strided_slice %21 {offsets = [0, 256], sizes = [16, 128], strides = [1, 1]} : vector<16x512xf32> to vector<16x128xf32>
      %35 = math.tanh %34 : vector<16x128xf32>
      %36 = vector.extract_strided_slice %21 {offsets = [0, 384], sizes = [16, 128], strides = [1, 1]} : vector<16x512xf32> to vector<16x128xf32>
      %37 = arith.negf %36 : vector<16x128xf32>
      %38 = math.exp %37 : vector<16x128xf32>
      %cst_16 = arith.constant 1.000000e+00 : f32
      %39 = vector.broadcast %cst_16 : f32 to vector<16x128xf32>
      %40 = arith.addf %39, %38 : vector<16x128xf32>
      %41 = arith.divf %39, %40 : vector<16x128xf32>
      %42 = arith.mulf %33, %12 : vector<16x128xf32>
      %43 = arith.mulf %27, %35 : vector<16x128xf32>
      %44 = arith.addf %42, %43 : vector<16x128xf32>
      %45 = math.tanh %44 : vector<16x128xf32>
      %46 = arith.mulf %41, %45 : vector<16x128xf32>
      %47 = arith.truncf %46 : vector<16x128xf32> to vector<16x128xbf16>
      %c0_17 = arith.constant 0 : index
      %48 = arith.index_cast %14 : i32 to index
      %c0_18 = arith.constant 0 : index
      %49 = vector.load %arg6[%c0_17, %48, %c0_18] : memref<1x128x128xbf16, #tpu.memory_space<vmem>>, vector<1x16x128xbf16>
      %50 = vector.shape_cast %49 : vector<1x16x128xbf16> to vector<16x128xbf16>
      %51 = vector.shape_cast %47 : vector<16x128xbf16> to vector<1x16x128xbf16>
      tpu.vector_store %arg6[%c0_17, %48, %c0_18], %51 {strides = array<i32>} : memref<1x128x128xbf16, #tpu.memory_space<vmem>>, vector<1x16x128xbf16>,
      %c1_i32_19 = arith.constant 1 : i32
      %c16_i32_20 = arith.constant 16 : i32
      %52 = arith.muli %c1_i32_19, %c16_i32_20 : i32
      %53 = tpu.assume_multiple %52, 16 : i32
      %c0_i32_21 = arith.constant 0 : i32
      %c0_i32_22 = arith.constant 0 : i32
      %54 = tpu.memref_slice %arg9[%10, %c0_i32_21, %c0_i32_22] : memref<2x128x512xf32, #tpu.memory_space<vmem>> -> memref<1x128x512xf32, #tpu.memory_space<vmem>>
      %55 = tpu.memref_squeeze %54 : memref<1x128x512xf32, #tpu.memory_space<vmem>> -> memref<128x512xf32, #tpu.memory_space<vmem>>
      %56 = arith.index_cast %53 : i32 to index
      %c0_23 = arith.constant 0 : index
      %57 = vector.load %55[%56, %c0_23] : memref<128x512xf32, #tpu.memory_space<vmem>>, vector<16x512xf32>
      %c0_24 = arith.constant 0 : index
      %c0_25 = arith.constant 0 : index
      %58 = vector.load %arg4[%c0_24, %c0_25] : memref<128x512xbf16, #tpu.memory_space<vmem>>, vector<128x512xbf16>
      %cst_26 = arith.constant dense<0.000000e+00> : vector<16x512xf32>
      %59 = tpu.matmul %47, %58, %cst_26 {dimension_numbers = #tpu.dot_dimension_numbers<[1], [0], [0], [1], [0, 0, 1, 1], [], []>} : vector<16x128xbf16>, vector<128x512xbf16>, vector<16x512xf32> -> vector<16x512xf32>
      %60 = arith.addf %57, %59 : vector<16x512xf32>
      %61 = vector.extract_strided_slice %60 {offsets = [0, 0], sizes = [16, 128], strides = [1, 1]} : vector<16x512xf32> to vector<16x128xf32>
      %62 = arith.negf %61 : vector<16x128xf32>
      %63 = math.exp %62 : vector<16x128xf32>
      %cst_27 = arith.constant 1.000000e+00 : f32
      %64 = vector.broadcast %cst_27 : f32 to vector<16x128xf32>
      %65 = arith.addf %64, %63 : vector<16x128xf32>
      %66 = arith.divf %64, %65 : vector<16x128xf32>
      %67 = vector.extract_strided_slice %60 {offsets = [0, 128], sizes = [16, 128], strides = [1, 1]} : vector<16x512xf32> to vector<16x128xf32>
      %68 = arith.negf %67 : vector<16x128xf32>
      %69 = math.exp %68 : vector<16x128xf32>
      %cst_28 = arith.constant 1.000000e+00 : f32
      %70 = vector.broadcast %cst_28 : f32 to vector<16x128xf32>
      %71 = arith.addf %70, %69 : vector<16x128xf32>
      %72 = arith.divf %70, %71 : vector<16x128xf32>
      %73 = vector.extract_strided_slice %60 {offsets = [0, 256], sizes = [16, 128], strides = [1, 1]} : vector<16x512xf32> to vector<16x128xf32>
      %74 = math.tanh %73 : vector<16x128xf32>
      %75 = vector.extract_strided_slice %60 {offsets = [0, 384], sizes = [16, 128], strides = [1, 1]} : vector<16x512xf32> to vector<16x128xf32>
      %76 = arith.negf %75 : vector<16x128xf32>
      %77 = math.exp %76 : vector<16x128xf32>
      %cst_29 = arith.constant 1.000000e+00 : f32
      %78 = vector.broadcast %cst_29 : f32 to vector<16x128xf32>
      %79 = arith.addf %78, %77 : vector<16x128xf32>
      %80 = arith.divf %78, %79 : vector<16x128xf32>
      %81 = arith.mulf %72, %44 : vector<16x128xf32>
      %82 = arith.mulf %66, %74 : vector<16x128xf32>
      %83 = arith.addf %81, %82 : vector<16x128xf32>
      %84 = math.tanh %83 : vector<16x128xf32>
      %85 = arith.mulf %80, %84 : vector<16x128xf32>
      %86 = arith.truncf %85 : vector<16x128xf32> to vector<16x128xbf16>
      %c0_30 = arith.constant 0 : index
      %87 = arith.index_cast %53 : i32 to index
      %c0_31 = arith.constant 0 : index
      %88 = vector.load %arg6[%c0_30, %87, %c0_31] : memref<1x128x128xbf16, #tpu.memory_space<vmem>>, vector<1x16x128xbf16>
      %89 = vector.shape_cast %88 : vector<1x16x128xbf16> to vector<16x128xbf16>
      %90 = vector.shape_cast %86 : vector<16x128xbf16> to vector<1x16x128xbf16>
      tpu.vector_store %arg6[%c0_30, %87, %c0_31], %90 {strides = array<i32>} : memref<1x128x128xbf16, #tpu.memory_space<vmem>>, vector<1x16x128xbf16>,
      %c2_i32_32 = arith.constant 2 : i32
      %c16_i32_33 = arith.constant 16 : i32
      %91 = arith.muli %c2_i32_32, %c16_i32_33 : i32
      %92 = tpu.assume_multiple %91, 16 : i32
      %c0_i32_34 = arith.constant 0 : i32
      %c0_i32_35 = arith.constant 0 : i32
      %93 = tpu.memref_slice %arg9[%10, %c0_i32_34, %c0_i32_35] : memref<2x128x512xf32, #tpu.memory_space<vmem>> -> memref<1x128x512xf32, #tpu.memory_space<vmem>>
      %94 = tpu.memref_squeeze %93 : memref<1x128x512xf32, #tpu.memory_space<vmem>> -> memref<128x512xf32, #tpu.memory_space<vmem>>
      %95 = arith.index_cast %92 : i32 to index
      %c0_36 = arith.constant 0 : index
      %96 = vector.load %94[%95, %c0_36] : memref<128x512xf32, #tpu.memory_space<vmem>>, vector<16x512xf32>
      %c0_37 = arith.constant 0 : index
      %c0_38 = arith.constant 0 : index
      %97 = vector.load %arg4[%c0_37, %c0_38] : memref<128x512xbf16, #tpu.memory_space<vmem>>, vector<128x512xbf16>
      %cst_39 = arith.constant dense<0.000000e+00> : vector<16x512xf32>
      %98 = tpu.matmul %86, %97, %cst_39 {dimension_numbers = #tpu.dot_dimension_numbers<[1], [0], [0], [1], [0, 0, 1, 1], [], []>} : vector<16x128xbf16>, vector<128x512xbf16>, vector<16x512xf32> -> vector<16x512xf32>
      %99 = arith.addf %96, %98 : vector<16x512xf32>
      %100 = vector.extract_strided_slice %99 {offsets = [0, 0], sizes = [16, 128], strides = [1, 1]} : vector<16x512xf32> to vector<16x128xf32>
      %101 = arith.negf %100 : vector<16x128xf32>
      %102 = math.exp %101 : vector<16x128xf32>
      %cst_40 = arith.constant 1.000000e+00 : f32
      %103 = vector.broadcast %cst_40 : f32 to vector<16x128xf32>
      %104 = arith.addf %103, %102 : vector<16x128xf32>
      %105 = arith.divf %103, %104 : vector<16x128xf32>
      %106 = vector.extract_strided_slice %99 {offsets = [0, 128], sizes = [16, 128], strides = [1, 1]} : vector<16x512xf32> to vector<16x128xf32>
      %107 = arith.negf %106 : vector<16x128xf32>
      %108 = math.exp %107 : vector<16x128xf32>
      %cst_41 = arith.constant 1.000000e+00 : f32
      %109 = vector.broadcast %cst_41 : f32 to vector<16x128xf32>
      %110 = arith.addf %109, %108 : vector<16x128xf32>
      %111 = arith.divf %109, %110 : vector<16x128xf32>
      %112 = vector.extract_strided_slice %99 {offsets = [0, 256], sizes = [16, 128], strides = [1, 1]} : vector<16x512xf32> to vector<16x128xf32>
      %113 = math.tanh %112 : vector<16x128xf32>
      %114 = vector.extract_strided_slice %99 {offsets = [0, 384], sizes = [16, 128], strides = [1, 1]} : vector<16x512xf32> to vector<16x128xf32>
      %115 = arith.negf %114 : vector<16x128xf32>
      %116 = math.exp %115 : vector<16x128xf32>
      %cst_42 = arith.constant 1.000000e+00 : f32
      %117 = vector.broadcast %cst_42 : f32 to vector<16x128xf32>
      %118 = arith.addf %117, %116 : vector<16x128xf32>
      %119 = arith.divf %117, %118 : vector<16x128xf32>
      %120 = arith.mulf %111, %83 : vector<16x128xf32>
      %121 = arith.mulf %105, %113 : vector<16x128xf32>
      %122 = arith.addf %120, %121 : vector<16x128xf32>
      %123 = math.tanh %122 : vector<16x128xf32>
      %124 = arith.mulf %119, %123 : vector<16x128xf32>
      %125 = arith.truncf %124 : vector<16x128xf32> to vector<16x128xbf16>
      %c0_43 = arith.constant 0 : index
      %126 = arith.index_cast %92 : i32 to index
      %c0_44 = arith.constant 0 : index
      %127 = vector.load %arg6[%c0_43, %126, %c0_44] : memref<1x128x128xbf16, #tpu.memory_space<vmem>>, vector<1x16x128xbf16>
      %128 = vector.shape_cast %127 : vector<1x16x128xbf16> to vector<16x128xbf16>
      %129 = vector.shape_cast %125 : vector<16x128xbf16> to vector<1x16x128xbf16>
      tpu.vector_store %arg6[%c0_43, %126, %c0_44], %129 {strides = array<i32>} : memref<1x128x128xbf16, #tpu.memory_space<vmem>>, vector<1x16x128xbf16>,
      %c3_i32 = arith.constant 3 : i32
      %c16_i32_45 = arith.constant 16 : i32
      %130 = arith.muli %c3_i32, %c16_i32_45 : i32
      %131 = tpu.assume_multiple %130, 16 : i32
      %c0_i32_46 = arith.constant 0 : i32
      %c0_i32_47 = arith.constant 0 : i32
      %132 = tpu.memref_slice %arg9[%10, %c0_i32_46, %c0_i32_47] : memref<2x128x512xf32, #tpu.memory_space<vmem>> -> memref<1x128x512xf32, #tpu.memory_space<vmem>>
      %133 = tpu.memref_squeeze %132 : memref<1x128x512xf32, #tpu.memory_space<vmem>> -> memref<128x512xf32, #tpu.memory_space<vmem>>
      %134 = arith.index_cast %131 : i32 to index
      %c0_48 = arith.constant 0 : index
      %135 = vector.load %133[%134, %c0_48] : memref<128x512xf32, #tpu.memory_space<vmem>>, vector<16x512xf32>
      %c0_49 = arith.constant 0 : index
      %c0_50 = arith.constant 0 : index
      %136 = vector.load %arg4[%c0_49, %c0_50] : memref<128x512xbf16, #tpu.memory_space<vmem>>, vector<128x512xbf16>
      %cst_51 = arith.constant dense<0.000000e+00> : vector<16x512xf32>
      %137 = tpu.matmul %125, %136, %cst_51 {dimension_numbers = #tpu.dot_dimension_numbers<[1], [0], [0], [1], [0, 0, 1, 1], [], []>} : vector<16x128xbf16>, vector<128x512xbf16>, vector<16x512xf32> -> vector<16x512xf32>
      %138 = arith.addf %135, %137 : vector<16x512xf32>
      %139 = vector.extract_strided_slice %138 {offsets = [0, 0], sizes = [16, 128], strides = [1, 1]} : vector<16x512xf32> to vector<16x128xf32>
      %140 = arith.negf %139 : vector<16x128xf32>
      %141 = math.exp %140 : vector<16x128xf32>
      %cst_52 = arith.constant 1.000000e+00 : f32
      %142 = vector.broadcast %cst_52 : f32 to vector<16x128xf32>
      %143 = arith.addf %142, %141 : vector<16x128xf32>
      %144 = arith.divf %142, %143 : vector<16x128xf32>
      %145 = vector.extract_strided_slice %138 {offsets = [0, 128], sizes = [16, 128], strides = [1, 1]} : vector<16x512xf32> to vector<16x128xf32>
      %146 = arith.negf %145 : vector<16x128xf32>
      %147 = math.exp %146 : vector<16x128xf32>
      %cst_53 = arith.constant 1.000000e+00 : f32
      %148 = vector.broadcast %cst_53 : f32 to vector<16x128xf32>
      %149 = arith.addf %148, %147 : vector<16x128xf32>
      %150 = arith.divf %148, %149 : vector<16x128xf32>
      %151 = vector.extract_strided_slice %138 {offsets = [0, 256], sizes = [16, 128], strides = [1, 1]} : vector<16x512xf32> to vector<16x128xf32>
      %152 = math.tanh %151 : vector<16x128xf32>
      %153 = vector.extract_strided_slice %138 {offsets = [0, 384], sizes = [16, 128], strides = [1, 1]} : vector<16x512xf32> to vector<16x128xf32>
      %154 = arith.negf %153 : vector<16x128xf32>
      %155 = math.exp %154 : vector<16x128xf32>
      %cst_54 = arith.constant 1.000000e+00 : f32
      %156 = vector.broadcast %cst_54 : f32 to vector<16x128xf32>
      %157 = arith.addf %156, %155 : vector<16x128xf32>
      %158 = arith.divf %156, %157 : vector<16x128xf32>
      %159 = arith.mulf %150, %122 : vector<16x128xf32>
      %160 = arith.mulf %144, %152 : vector<16x128xf32>
      %161 = arith.addf %159, %160 : vector<16x128xf32>
      %162 = math.tanh %161 : vector<16x128xf32>
      %163 = arith.mulf %158, %162 : vector<16x128xf32>
      %164 = arith.truncf %163 : vector<16x128xf32> to vector<16x128xbf16>
      %c0_55 = arith.constant 0 : index
      %165 = arith.index_cast %131 : i32 to index
      %c0_56 = arith.constant 0 : index
      %166 = vector.load %arg6[%c0_55, %165, %c0_56] : memref<1x128x128xbf16, #tpu.memory_space<vmem>>, vector<1x16x128xbf16>
      %167 = vector.shape_cast %166 : vector<1x16x128xbf16> to vector<16x128xbf16>
      %168 = vector.shape_cast %164 : vector<16x128xbf16> to vector<1x16x128xbf16>
      tpu.vector_store %arg6[%c0_55, %165, %c0_56], %168 {strides = array<i32>} : memref<1x128x128xbf16, #tpu.memory_space<vmem>>, vector<1x16x128xbf16>,
      %c4_i32 = arith.constant 4 : i32
      %c16_i32_57 = arith.constant 16 : i32
      %169 = arith.muli %c4_i32, %c16_i32_57 : i32
      %170 = tpu.assume_multiple %169, 16 : i32
      %c0_i32_58 = arith.constant 0 : i32
      %c0_i32_59 = arith.constant 0 : i32
      %171 = tpu.memref_slice %arg9[%10, %c0_i32_58, %c0_i32_59] : memref<2x128x512xf32, #tpu.memory_space<vmem>> -> memref<1x128x512xf32, #tpu.memory_space<vmem>>
      %172 = tpu.memref_squeeze %171 : memref<1x128x512xf32, #tpu.memory_space<vmem>> -> memref<128x512xf32, #tpu.memory_space<vmem>>
      %173 = arith.index_cast %170 : i32 to index
      %c0_60 = arith.constant 0 : index
      %174 = vector.load %172[%173, %c0_60] : memref<128x512xf32, #tpu.memory_space<vmem>>, vector<16x512xf32>
      %c0_61 = arith.constant 0 : index
      %c0_62 = arith.constant 0 : index
      %175 = vector.load %arg4[%c0_61, %c0_62] : memref<128x512xbf16, #tpu.memory_space<vmem>>, vector<128x512xbf16>
      %cst_63 = arith.constant dense<0.000000e+00> : vector<16x512xf32>
      %176 = tpu.matmul %164, %175, %cst_63 {dimension_numbers = #tpu.dot_dimension_numbers<[1], [0], [0], [1], [0, 0, 1, 1], [], []>} : vector<16x128xbf16>, vector<128x512xbf16>, vector<16x512xf32> -> vector<16x512xf32>
      %177 = arith.addf %174, %176 : vector<16x512xf32>
      %178 = vector.extract_strided_slice %177 {offsets = [0, 0], sizes = [16, 128], strides = [1, 1]} : vector<16x512xf32> to vector<16x128xf32>
      %179 = arith.negf %178 : vector<16x128xf32>
      %180 = math.exp %179 : vector<16x128xf32>
      %cst_64 = arith.constant 1.000000e+00 : f32
      %181 = vector.broadcast %cst_64 : f32 to vector<16x128xf32>
      %182 = arith.addf %181, %180 : vector<16x128xf32>
      %183 = arith.divf %181, %182 : vector<16x128xf32>
      %184 = vector.extract_strided_slice %177 {offsets = [0, 128], sizes = [16, 128], strides = [1, 1]} : vector<16x512xf32> to vector<16x128xf32>
      %185 = arith.negf %184 : vector<16x128xf32>
      %186 = math.exp %185 : vector<16x128xf32>
      %cst_65 = arith.constant 1.000000e+00 : f32
      %187 = vector.broadcast %cst_65 : f32 to vector<16x128xf32>
      %188 = arith.addf %187, %186 : vector<16x128xf32>
      %189 = arith.divf %187, %188 : vector<16x128xf32>
      %190 = vector.extract_strided_slice %177 {offsets = [0, 256], sizes = [16, 128], strides = [1, 1]} : vector<16x512xf32> to vector<16x128xf32>
      %191 = math.tanh %190 : vector<16x128xf32>
      %192 = vector.extract_strided_slice %177 {offsets = [0, 384], sizes = [16, 128], strides = [1, 1]} : vector<16x512xf32> to vector<16x128xf32>
      %193 = arith.negf %192 : vector<16x128xf32>
      %194 = math.exp %193 : vector<16x128xf32>
      %cst_66 = arith.constant 1.000000e+00 : f32
      %195 = vector.broadcast %cst_66 : f32 to vector<16x128xf32>
      %196 = arith.addf %195, %194 : vector<16x128xf32>
      %197 = arith.divf %195, %196 : vector<16x128xf32>
      %198 = arith.mulf %189, %161 : vector<16x128xf32>
      %199 = arith.mulf %183, %191 : vector<16x128xf32>
      %200 = arith.addf %198, %199 : vector<16x128xf32>
      %201 = math.tanh %200 : vector<16x128xf32>
      %202 = arith.mulf %197, %201 : vector<16x128xf32>
      %203 = arith.truncf %202 : vector<16x128xf32> to vector<16x128xbf16>
      %c0_67 = arith.constant 0 : index
      %204 = arith.index_cast %170 : i32 to index
      %c0_68 = arith.constant 0 : index
      %205 = vector.load %arg6[%c0_67, %204, %c0_68] : memref<1x128x128xbf16, #tpu.memory_space<vmem>>, vector<1x16x128xbf16>
      %206 = vector.shape_cast %205 : vector<1x16x128xbf16> to vector<16x128xbf16>
      %207 = vector.shape_cast %203 : vector<16x128xbf16> to vector<1x16x128xbf16>
      tpu.vector_store %arg6[%c0_67, %204, %c0_68], %207 {strides = array<i32>} : memref<1x128x128xbf16, #tpu.memory_space<vmem>>, vector<1x16x128xbf16>,
      %c5_i32 = arith.constant 5 : i32
      %c16_i32_69 = arith.constant 16 : i32
      %208 = arith.muli %c5_i32, %c16_i32_69 : i32
      %209 = tpu.assume_multiple %208, 16 : i32
      %c0_i32_70 = arith.constant 0 : i32
      %c0_i32_71 = arith.constant 0 : i32
      %210 = tpu.memref_slice %arg9[%10, %c0_i32_70, %c0_i32_71] : memref<2x128x512xf32, #tpu.memory_space<vmem>> -> memref<1x128x512xf32, #tpu.memory_space<vmem>>
      %211 = tpu.memref_squeeze %210 : memref<1x128x512xf32, #tpu.memory_space<vmem>> -> memref<128x512xf32, #tpu.memory_space<vmem>>
      %212 = arith.index_cast %209 : i32 to index
      %c0_72 = arith.constant 0 : index
      %213 = vector.load %211[%212, %c0_72] : memref<128x512xf32, #tpu.memory_space<vmem>>, vector<16x512xf32>
      %c0_73 = arith.constant 0 : index
      %c0_74 = arith.constant 0 : index
      %214 = vector.load %arg4[%c0_73, %c0_74] : memref<128x512xbf16, #tpu.memory_space<vmem>>, vector<128x512xbf16>
      %cst_75 = arith.constant dense<0.000000e+00> : vector<16x512xf32>
      %215 = tpu.matmul %203, %214, %cst_75 {dimension_numbers = #tpu.dot_dimension_numbers<[1], [0], [0], [1], [0, 0, 1, 1], [], []>} : vector<16x128xbf16>, vector<128x512xbf16>, vector<16x512xf32> -> vector<16x512xf32>
      %216 = arith.addf %213, %215 : vector<16x512xf32>
      %217 = vector.extract_strided_slice %216 {offsets = [0, 0], sizes = [16, 128], strides = [1, 1]} : vector<16x512xf32> to vector<16x128xf32>
      %218 = arith.negf %217 : vector<16x128xf32>
      %219 = math.exp %218 : vector<16x128xf32>
      %cst_76 = arith.constant 1.000000e+00 : f32
      %220 = vector.broadcast %cst_76 : f32 to vector<16x128xf32>
      %221 = arith.addf %220, %219 : vector<16x128xf32>
      %222 = arith.divf %220, %221 : vector<16x128xf32>
      %223 = vector.extract_strided_slice %216 {offsets = [0, 128], sizes = [16, 128], strides = [1, 1]} : vector<16x512xf32> to vector<16x128xf32>
      %224 = arith.negf %223 : vector<16x128xf32>
      %225 = math.exp %224 : vector<16x128xf32>
      %cst_77 = arith.constant 1.000000e+00 : f32
      %226 = vector.broadcast %cst_77 : f32 to vector<16x128xf32>
      %227 = arith.addf %226, %225 : vector<16x128xf32>
      %228 = arith.divf %226, %227 : vector<16x128xf32>
      %229 = vector.extract_strided_slice %216 {offsets = [0, 256], sizes = [16, 128], strides = [1, 1]} : vector<16x512xf32> to vector<16x128xf32>
      %230 = math.tanh %229 : vector<16x128xf32>
      %231 = vector.extract_strided_slice %216 {offsets = [0, 384], sizes = [16, 128], strides = [1, 1]} : vector<16x512xf32> to vector<16x128xf32>
      %232 = arith.negf %231 : vector<16x128xf32>
      %233 = math.exp %232 : vector<16x128xf32>
      %cst_78 = arith.constant 1.000000e+00 : f32
      %234 = vector.broadcast %cst_78 : f32 to vector<16x128xf32>
      %235 = arith.addf %234, %233 : vector<16x128xf32>
      %236 = arith.divf %234, %235 : vector<16x128xf32>
      %237 = arith.mulf %228, %200 : vector<16x128xf32>
      %238 = arith.mulf %222, %230 : vector<16x128xf32>
      %239 = arith.addf %237, %238 : vector<16x128xf32>
      %240 = math.tanh %239 : vector<16x128xf32>
      %241 = arith.mulf %236, %240 : vector<16x128xf32>
      %242 = arith.truncf %241 : vector<16x128xf32> to vector<16x128xbf16>
      %c0_79 = arith.constant 0 : index
      %243 = arith.index_cast %209 : i32 to index
      %c0_80 = arith.constant 0 : index
      %244 = vector.load %arg6[%c0_79, %243, %c0_80] : memref<1x128x128xbf16, #tpu.memory_space<vmem>>, vector<1x16x128xbf16>
      %245 = vector.shape_cast %244 : vector<1x16x128xbf16> to vector<16x128xbf16>
      %246 = vector.shape_cast %242 : vector<16x128xbf16> to vector<1x16x128xbf16>
      tpu.vector_store %arg6[%c0_79, %243, %c0_80], %246 {strides = array<i32>} : memref<1x128x128xbf16, #tpu.memory_space<vmem>>, vector<1x16x128xbf16>,
      %c6_i32 = arith.constant 6 : i32
      %c16_i32_81 = arith.constant 16 : i32
      %247 = arith.muli %c6_i32, %c16_i32_81 : i32
      %248 = tpu.assume_multiple %247, 16 : i32
      %c0_i32_82 = arith.constant 0 : i32
      %c0_i32_83 = arith.constant 0 : i32
      %249 = tpu.memref_slice %arg9[%10, %c0_i32_82, %c0_i32_83] : memref<2x128x512xf32, #tpu.memory_space<vmem>> -> memref<1x128x512xf32, #tpu.memory_space<vmem>>
      %250 = tpu.memref_squeeze %249 : memref<1x128x512xf32, #tpu.memory_space<vmem>> -> memref<128x512xf32, #tpu.memory_space<vmem>>
      %251 = arith.index_cast %248 : i32 to index
      %c0_84 = arith.constant 0 : index
      %252 = vector.load %250[%251, %c0_84] : memref<128x512xf32, #tpu.memory_space<vmem>>, vector<16x512xf32>
      %c0_85 = arith.constant 0 : index
      %c0_86 = arith.constant 0 : index
      %253 = vector.load %arg4[%c0_85, %c0_86] : memref<128x512xbf16, #tpu.memory_space<vmem>>, vector<128x512xbf16>
      %cst_87 = arith.constant dense<0.000000e+00> : vector<16x512xf32>
      %254 = tpu.matmul %242, %253, %cst_87 {dimension_numbers = #tpu.dot_dimension_numbers<[1], [0], [0], [1], [0, 0, 1, 1], [], []>} : vector<16x128xbf16>, vector<128x512xbf16>, vector<16x512xf32> -> vector<16x512xf32>
      %255 = arith.addf %252, %254 : vector<16x512xf32>
      %256 = vector.extract_strided_slice %255 {offsets = [0, 0], sizes = [16, 128], strides = [1, 1]} : vector<16x512xf32> to vector<16x128xf32>
      %257 = arith.negf %256 : vector<16x128xf32>
      %258 = math.exp %257 : vector<16x128xf32>
      %cst_88 = arith.constant 1.000000e+00 : f32
      %259 = vector.broadcast %cst_88 : f32 to vector<16x128xf32>
      %260 = arith.addf %259, %258 : vector<16x128xf32>
      %261 = arith.divf %259, %260 : vector<16x128xf32>
      %262 = vector.extract_strided_slice %255 {offsets = [0, 128], sizes = [16, 128], strides = [1, 1]} : vector<16x512xf32> to vector<16x128xf32>
      %263 = arith.negf %262 : vector<16x128xf32>
      %264 = math.exp %263 : vector<16x128xf32>
      %cst_89 = arith.constant 1.000000e+00 : f32
      %265 = vector.broadcast %cst_89 : f32 to vector<16x128xf32>
      %266 = arith.addf %265, %264 : vector<16x128xf32>
      %267 = arith.divf %265, %266 : vector<16x128xf32>
      %268 = vector.extract_strided_slice %255 {offsets = [0, 256], sizes = [16, 128], strides = [1, 1]} : vector<16x512xf32> to vector<16x128xf32>
      %269 = math.tanh %268 : vector<16x128xf32>
      %270 = vector.extract_strided_slice %255 {offsets = [0, 384], sizes = [16, 128], strides = [1, 1]} : vector<16x512xf32> to vector<16x128xf32>
      %271 = arith.negf %270 : vector<16x128xf32>
      %272 = math.exp %271 : vector<16x128xf32>
      %cst_90 = arith.constant 1.000000e+00 : f32
      %273 = vector.broadcast %cst_90 : f32 to vector<16x128xf32>
      %274 = arith.addf %273, %272 : vector<16x128xf32>
      %275 = arith.divf %273, %274 : vector<16x128xf32>
      %276 = arith.mulf %267, %239 : vector<16x128xf32>
      %277 = arith.mulf %261, %269 : vector<16x128xf32>
      %278 = arith.addf %276, %277 : vector<16x128xf32>
      %279 = math.tanh %278 : vector<16x128xf32>
      %280 = arith.mulf %275, %279 : vector<16x128xf32>
      %281 = arith.truncf %280 : vector<16x128xf32> to vector<16x128xbf16>
      %c0_91 = arith.constant 0 : index
      %282 = arith.index_cast %248 : i32 to index
      %c0_92 = arith.constant 0 : index
      %283 = vector.load %arg6[%c0_91, %282, %c0_92] : memref<1x128x128xbf16, #tpu.memory_space<vmem>>, vector<1x16x128xbf16>
      %284 = vector.shape_cast %283 : vector<1x16x128xbf16> to vector<16x128xbf16>
      %285 = vector.shape_cast %281 : vector<16x128xbf16> to vector<1x16x128xbf16>
      tpu.vector_store %arg6[%c0_91, %282, %c0_92], %285 {strides = array<i32>} : memref<1x128x128xbf16, #tpu.memory_space<vmem>>, vector<1x16x128xbf16>,
      %c7_i32 = arith.constant 7 : i32
      %c16_i32_93 = arith.constant 16 : i32
      %286 = arith.muli %c7_i32, %c16_i32_93 : i32
      %287 = tpu.assume_multiple %286, 16 : i32
      %c0_i32_94 = arith.constant 0 : i32
      %c0_i32_95 = arith.constant 0 : i32
      %288 = tpu.memref_slice %arg9[%10, %c0_i32_94, %c0_i32_95] : memref<2x128x512xf32, #tpu.memory_space<vmem>> -> memref<1x128x512xf32, #tpu.memory_space<vmem>>
      %289 = tpu.memref_squeeze %288 : memref<1x128x512xf32, #tpu.memory_space<vmem>> -> memref<128x512xf32, #tpu.memory_space<vmem>>
      %290 = arith.index_cast %287 : i32 to index
      %c0_96 = arith.constant 0 : index
      %291 = vector.load %289[%290, %c0_96] : memref<128x512xf32, #tpu.memory_space<vmem>>, vector<16x512xf32>
      %c0_97 = arith.constant 0 : index
      %c0_98 = arith.constant 0 : index
      %292 = vector.load %arg4[%c0_97, %c0_98] : memref<128x512xbf16, #tpu.memory_space<vmem>>, vector<128x512xbf16>
      %cst_99 = arith.constant dense<0.000000e+00> : vector<16x512xf32>
      %293 = tpu.matmul %281, %292, %cst_99 {dimension_numbers = #tpu.dot_dimension_numbers<[1], [0], [0], [1], [0, 0, 1, 1], [], []>} : vector<16x128xbf16>, vector<128x512xbf16>, vector<16x512xf32> -> vector<16x512xf32>
      %294 = arith.addf %291, %293 : vector<16x512xf32>
      %295 = vector.extract_strided_slice %294 {offsets = [0, 0], sizes = [16, 128], strides = [1, 1]} : vector<16x512xf32> to vector<16x128xf32>
      %296 = arith.negf %295 : vector<16x128xf32>
      %297 = math.exp %296 : vector<16x128xf32>
      %cst_100 = arith.constant 1.000000e+00 : f32
      %298 = vector.broadcast %cst_100 : f32 to vector<16x128xf32>
      %299 = arith.addf %298, %297 : vector<16x128xf32>
      %300 = arith.divf %298, %299 : vector<16x128xf32>
      %301 = vector.extract_strided_slice %294 {offsets = [0, 128], sizes = [16, 128], strides = [1, 1]} : vector<16x512xf32> to vector<16x128xf32>
      %302 = arith.negf %301 : vector<16x128xf32>
      %303 = math.exp %302 : vector<16x128xf32>
      %cst_101 = arith.constant 1.000000e+00 : f32
      %304 = vector.broadcast %cst_101 : f32 to vector<16x128xf32>
      %305 = arith.addf %304, %303 : vector<16x128xf32>
      %306 = arith.divf %304, %305 : vector<16x128xf32>
      %307 = vector.extract_strided_slice %294 {offsets = [0, 256], sizes = [16, 128], strides = [1, 1]} : vector<16x512xf32> to vector<16x128xf32>
      %308 = math.tanh %307 : vector<16x128xf32>
      %309 = vector.extract_strided_slice %294 {offsets = [0, 384], sizes = [16, 128], strides = [1, 1]} : vector<16x512xf32> to vector<16x128xf32>
      %310 = arith.negf %309 : vector<16x128xf32>
      %311 = math.exp %310 : vector<16x128xf32>
      %cst_102 = arith.constant 1.000000e+00 : f32
      %312 = vector.broadcast %cst_102 : f32 to vector<16x128xf32>
      %313 = arith.addf %312, %311 : vector<16x128xf32>
      %314 = arith.divf %312, %313 : vector<16x128xf32>
      %315 = arith.mulf %306, %278 : vector<16x128xf32>
      %316 = arith.mulf %300, %308 : vector<16x128xf32>
      %317 = arith.addf %315, %316 : vector<16x128xf32>
      %318 = math.tanh %317 : vector<16x128xf32>
      %319 = arith.mulf %314, %318 : vector<16x128xf32>
      %320 = arith.truncf %319 : vector<16x128xf32> to vector<16x128xbf16>
      %c0_103 = arith.constant 0 : index
      %321 = arith.index_cast %287 : i32 to index
      %c0_104 = arith.constant 0 : index
      %322 = vector.load %arg6[%c0_103, %321, %c0_104] : memref<1x128x128xbf16, #tpu.memory_space<vmem>>, vector<1x16x128xbf16>
      %323 = vector.shape_cast %322 : vector<1x16x128xbf16> to vector<16x128xbf16>
      %324 = vector.shape_cast %320 : vector<16x128xbf16> to vector<1x16x128xbf16>
      tpu.vector_store %arg6[%c0_103, %321, %c0_104], %324 {strides = array<i32>} : memref<1x128x128xbf16, #tpu.memory_space<vmem>>, vector<1x16x128xbf16>,
      %c8_i32 = arith.constant 8 : i32
      %c0_105 = arith.constant 0 : index
      %c0_106 = arith.constant 0 : index
      %325 = vector.load %arg7[%c0_105, %c0_106] : memref<16x128xbf16, #tpu.memory_space<vmem>>, vector<16x128xbf16>
      tpu.vector_store %arg7[%c0_105, %c0_106], %320 {strides = array<i32>} : memref<16x128xbf16, #tpu.memory_space<vmem>>, vector<16x128xbf16>,
      %c0_107 = arith.constant 0 : index
      %c0_108 = arith.constant 0 : index
      %326 = vector.load %arg8[%c0_107, %c0_108] : memref<16x128xf32, #tpu.memory_space<vmem>>, vector<16x128xf32>
      tpu.vector_store %arg8[%c0_107, %c0_108], %317 {strides = array<i32>} : memref<16x128xf32, #tpu.memory_space<vmem>>, vector<16x128xf32>,
    } else {
    }
    %c1_i32 = arith.constant 1 : i32
    %6 = arith.cmpi slt, %arg1, %c1_i32 : i32
    %7 = arith.extui %6 : i1 to i32
    %c0_i32_3 = arith.constant 0 : i32
    %8 = arith.cmpi ne, %7, %c0_i32_3 : i32
    scf.if %8 {
      %c2_i32 = arith.constant 2 : i32
      %9 = arith.remsi %arg1, %c2_i32 : i32
      %c0 = arith.constant 0 : index
      %c0_4 = arith.constant 0 : index
      %c0_5 = arith.constant 0 : index
      %10 = vector.load %arg2[%c0, %c0_4, %c0_5] : memref<1x128x4xbf16, #tpu.memory_space<vmem>>, vector<1x128x4xbf16>
      %11 = vector.shape_cast %10 : vector<1x128x4xbf16> to vector<128x4xbf16>
      %c0_6 = arith.constant 0 : index
      %c0_7 = arith.constant 0 : index
      %12 = vector.load %arg3[%c0_6, %c0_7] : memref<4x512xbf16, #tpu.memory_space<vmem>>, vector<4x512xbf16>
      %cst = arith.constant dense<0.000000e+00> : vector<128x512xf32>
      %13 = tpu.matmul %11, %12, %cst {dimension_numbers = #tpu.dot_dimension_numbers<[1], [0], [0], [1], [0, 0, 1, 1], [], []>} : vector<128x4xbf16>, vector<4x512xbf16>, vector<128x512xf32> -> vector<128x512xf32>
      %c0_8 = arith.constant 0 : index
      %c0_9 = arith.constant 0 : index
      %14 = vector.load %arg5[%c0_8, %c0_9] : memref<1x512xf32, #tpu.memory_space<vmem>>, vector<1x512xf32>
      %15 = vector.broadcast %14 : vector<1x512xf32> to vector<128x512xf32>
      %16 = arith.addf %13, %15 : vector<128x512xf32>
      %17 = arith.index_cast %9 : i32 to index
      %c0_10 = arith.constant 0 : index
      %c0_11 = arith.constant 0 : index
      %18 = vector.load %arg9[%17, %c0_10, %c0_11] : memref<2x128x512xf32, #tpu.memory_space<vmem>>, vector<1x128x512xf32>
      %19 = vector.shape_cast %18 : vector<1x128x512xf32> to vector<128x512xf32>
      %20 = vector.shape_cast %16 : vector<128x512xf32> to vector<1x128x512xf32>
      tpu.vector_store %arg9[%17, %c0_10, %c0_11], %20 {strides = array<i32>} : memref<2x128x512xf32, #tpu.memory_space<vmem>>, vector<1x128x512xf32>,
    } else {
    }
    return
  }
  func.func @transform_0(%arg0: i32, %arg1: i32) -> (i32, i32, i32) {
    %c0_i32 = arith.constant 0 : i32
    %0 = arith.minsi %arg1, %c0_i32 : i32
    %c0_i32_0 = arith.constant 0 : i32
    %c0_i32_1 = arith.constant 0 : i32
    return %arg0, %0, %c0_i32_0 : i32, i32, i32
  }
  func.func @transform_1(%arg0: i32, %arg1: i32) -> (i32, i32) {
    %c0_i32 = arith.constant 0 : i32
    %c0_i32_0 = arith.constant 0 : i32
    %c0_i32_1 = arith.constant 0 : i32
    return %c0_i32, %c0_i32_0 : i32, i32
  }
  func.func @transform_2(%arg0: i32, %arg1: i32) -> (i32, i32) {
    %c0_i32 = arith.constant 0 : i32
    %c0_i32_0 = arith.constant 0 : i32
    %c0_i32_1 = arith.constant 0 : i32
    return %c0_i32, %c0_i32_0 : i32, i32
  }
  func.func @transform_3(%arg0: i32, %arg1: i32) -> (i32, i32) {
    %c0_i32 = arith.constant 0 : i32
    %c0_i32_0 = arith.constant 0 : i32
    %c0_i32_1 = arith.constant 0 : i32
    return %c0_i32, %c0_i32_0 : i32, i32
  }
  func.func @transform_4(%arg0: i32, %arg1: i32) -> (i32, i32, i32) {
    %c1_i32 = arith.constant 1 : i32
    %0 = arith.subi %arg1, %c1_i32 : i32
    %c0_i32 = arith.constant 0 : i32
    %1 = arith.maxsi %0, %c0_i32 : i32
    %c0_i32_0 = arith.constant 0 : i32
    %c0_i32_1 = arith.constant 0 : i32
    return %arg0, %1, %c0_i32_0 : i32, i32, i32
  }
}

</mosaic_0001>

<bundles_post_ra>
// kernel: tpu_custom_call.1
= control target key start
LH: loop header
LB: loop body
LE: loop exit
PB: predicated region body
PF: predicated region fallthrough
CT: control target
= control target key end

     0   :  { %9 = vsyncpa [#allocation6], 0  ;;  %s5650_s0 = inlined_call_operand.vmem [shape: bf16[1,128,4], index: 0, kind: input, shape index: {}]   ;;  %s5651_s1 = inlined_call_operand.vmem [shape: bf16[4,512], index: 1, kind: input, shape index: {}]   ;;  %s5652_s2 = inlined_call_operand.hbm [shape: bf16[128,512], index: 2, kind: input, shape index: {}]   ;;  %s5653_s3 = inlined_call_operand.vmem [shape: f32[1,512], index: 3, kind: input, shape index: {}]   ;;  %s5654_s4 = inlined_call_operand.hbm [shape: bf16[1,128,128], index: 4, kind: output, shape index: {}]  }
   0x1   :  { %10 = vsyncpa [#allocation7], 0 }
   0x2   :  { %12 = vsyncpa [#allocation7 + $0x1], 0  ;;  %s4817_s15 = smov 0   ;;  %s4819_s16 = smov 0  }
   0x3   :  { %s4821_s17 = smov 0   ;;  %s4823_s18 = smov 0  }
   0x4   :  { %s4825_s19 = smov 0  }
   0x5 LB: > { %s3708_s20 = sadd.s32 4294967295, %s4779_s19   ;;  %s3709_s21 = sadd.s32 4294967294, %s4779_s19   ;;  %s4779_s19 = sphi %s4825_s19, %s18_s19   ;;  %s4775_s18 = sphi %s4823_s18, %s5661_s18   ;;  %s4771_s17 = sphi %s4821_s17, %s5660_s17   ;;  %s4767_s16 = sphi %s4819_s16, %s5640_s16   ;;  %s4763_s15 = sphi %s4817_s15, %s5659_s15  }
   0x6   : > { %s27_s22 = sadd.s32 1, %s4775_s18  ;;  %p4760_p1 = scmp.ne.s32.totalorder %s4767_s16, 0 }
   0x7   : > { %p28_p0 = scmp.ge.s32.totalorder %s27_s22, 2  ;;  %p151_p2 = scmp.eq.s32.totalorder %s3708_s20, 1 }
   0x8   : > { %p156_p3 = scmp.ne.s32.totalorder %s4767_s16, %s4763_s15  ;;  %p157_p5 = scmp.eq.s32.totalorder %s3709_s21, 1 }
   0x9   : > { %s5663_s22 = smov (%p28_p0, %s27_s22), 0  ;;  %p4850_p4 = por %p4760_p1, %p151_p2 }
   0xa   : > { %p4854_p6 = por %p157_p5, %p156_p3  ;;  %p3712_p7 = scmp.ge.s32.totalorder %s4779_s19, 1 }
   0xb   : > { %p164_p8 = scmp.lt.s32.totalorder %s4779_s19, 3  ;;  %p4864_p10 = scmp.eq.s32.totalorder %s3708_s20, 0 }
   0xc   : > { %s4781_s27 = smov [#allocation5]  }
   0xd   : > { %p4860_p9 = pnand %p3712_p7, %p164_p8  ;;  %s179_s28 = sshll.u32 %s4781_s27, 4  ;;  %s180_s28 = int_to_ptr.vmem [resolvable:$true] %s179_s28 }
   0xe   : > { %s4687_s29 = scalar_lea.vmem %s180_s28, 4096  ;;  %p4695_p3 = scmp.lt.s32.totalorder %s180_s28, %s180_s28 }
   0xf   : > { %p4230_p11 = pneg %p4860_p9  ;;  %p4688_p0 = scmp.ne.s32.totalorder %s180_s28, %s4687_s29 }
  0x10   : > { %p4696_p5 = scmp.lt.s32.totalorder %s4687_s29, %s4687_s29 }
  0x11   : > { %p4231_p12 = pnand %p4864_p10, %p4230_p11 }
  0x12   : > { %p4697_p7 = por %p4696_p5, %p4695_p3 }
  0x13   : > { %p4678_p13 = pneg %p4231_p12 }
  0x15   : > { %p4690_p1 = pnand %p4688_p0, %p4678_p13 }
  0x17   : > { %p4691_p2 = pneg %p4690_p1 }
  0x19   : > { %p4698_p8 = pnand %p4697_p7, %p4691_p2 }
  0x1b   : > { %4701 = shalt.err (!%p4698_p8)
}
  0x1c   : > { %s4782_s30 = smov 256   ;;  %s4783_s5 = smov 16  }
  0x1d   : > { %4233 = dma.hbm_to_vmem [thread:$0]  (!%p4231_p12), %s5652_s2, 4096, %s180_s28, [#allocation6], %s4782_s30, %s4782_s30, %s4783_s5  }
  0x1e   : > { %215 = sbr.rel (%p4860_p9) target bundleno = 2437 (0x985), region = 36 }
  0x23   : > { %4753 = dma.done.wait (%p4864_p10), [#allocation6], 4096  }
  0x24   : > { %4755 = vsyncadd (%p4864_p10), [#allocation6], 4294963200  ;;  %s244_s8 = sand.u32 1, %s4767_s16   ;;  %p247_p11 = scmp.lt.s32.totalorder %s4771_s17, 0 }
  0x25   : > { %s3717_s9 = sshll.u32 %s244_s8, 6  ;;  %p3720_p9 = scmp.ne.s32.totalorder %s4771_s17, 0 }
  0x26   : > { %s248_s10 = scalar_select %p247_p11, %s4771_s17, 0 }
  0x27   : > { %s4893_s21 = scalar_lea.vmem [#allocation8], %s3717_s9 }
  0x28   : > { %s3718_s11 = sshll.u32 %s248_s10, 4 }
  0x29   : > { %p252_p12 = scmp.lt.s32.totalorder %s3718_s11, 15  ;;  %269 = sbr.rel (%p3720_p9) target bundleno = 49 (0x31), region = 44 }
  0x2b   : > { %s5665_s11 = smov (!%p252_p12, %s3718_s11), 15 }
  0x2c   : > { %s3719_s12 = sshll.u32 %s5665_s11, 2 }
  0x2d   : > { %s4891_s20 = scalar_lea.vmem %s5650_s0, %s3719_s12 }
  0x2e   : > { %v4784_v0 = vmov 0   ;;  %v4785_v1 = vmov 0.0  }
  0x2f   : > { %270 = vst [vmem:[#allocation2] sm:$0xf] %v4784_v0  ;;  %271 = vst [vmem:[#allocation2 + $0x4] sm:$0xf] %v4784_v0 }
  0x30   : > { %272 = vst [vmem:[#allocation3] sm:$0xff] %v4785_v1  ;;  %273 = vst [vmem:[#allocation3 + $0x8] sm:$0xff] %v4785_v1 }
  0x31 PF: > { %p3721_p10 = scmp.le.s32.totalorder %s4771_s17, 0 }
  0x32   : > { %s3722_s25 = sadd.s32 (!%p3721_p10), 4294967295, %s4771_s17 }
  0x33   : > { %277 = sbr.rel (%p3721_p10) target bundleno = 2131 (0x853), region = 48  ;;  %s280_s26 = ssub.s32 (!%p3721_p10), 0, %s3722_s25 }
  0x34   : > { %s3723_s27 = smin.u32 (!%p3721_p10), %s3722_s25, %s280_s26  ;;  %p279_p13 = scmp.lt.s32.totalorder (!%p3721_p10), %s3722_s25, 0 }
  0x35   : > { %s282_s28 = sand.u32 (!%p3721_p10), 1, %s3723_s27  }
  0x36   : > { %s283_s29 = ssub.s32 (!%p3721_p10), 0, %s282_s28 }
  0x38   : > { %v4897_v2 = vld [vmem:[#allocation5 + $0xe4] ss:$16 sps:$4 sm:$0xff]   ;;  %v4899_v3 = vld [vmem:[#allocation5 + $0xe0] ss:$16 sps:$4 sm:$0xff]   ;;  %v4786_v4 = vmov 0   ;;  %v4338_v34 = vld [vmem:[#allocation2] sm:$0xff]   ;;  %s5667_s29 = smov (!%p279_p13, %s283_s29), %s282_s28 }
  0x39   : > { %533 = vmatprep.mubr.bf16.mxu0 %v4786_v4  ;;  %576 = vmatprep.mubr.bf16.mxu1 %v4786_v4  ;;  %v4904_v5 = vld [vmem:[#allocation5 + $0xc4] ss:$16 sps:$4 sm:$0xff]   ;;  %v4907_v6 = vld [vmem:[#allocation5 + $0xc0] ss:$16 sps:$4 sm:$0xff]   ;;  %v4912_v8 = vld [vmem:[#allocation5 + $0xec] ss:$16 sps:$4 sm:$0xff]  }
  0x3a   : > { %501 = vmatprep.subr.bf16.mxu0 %v4897_v2  ;;  %v4910_v7 = vld [vmem:[#allocation5 + $0xa4] ss:$16 sps:$4 sm:$0xff]   ;;  %v4914_v9 = vld [vmem:[#allocation5 + $0xe8] ss:$16 sps:$4 sm:$0xff]   ;;  %v4917_v10 = vld [vmem:[#allocation5 + $0xa0] ss:$16 sps:$4 sm:$0xff]   ;;  %544 = vmatprep.subr.bf16.mxu1 %v4912_v8 }
  0x3b   : > { %502 = vmatpush1.bf16.msra.mxu0 %v4899_v3  ;;  %v4921_v11 = vld [vmem:[#allocation5 + $0x84] ss:$16 sps:$4 sm:$0xff]   ;;  %545 = vmatpush1.bf16.msra.mxu1 %v4914_v9  ;;  %v4924_v12 = vld [vmem:[#allocation5 + $0xcc] ss:$16 sps:$4 sm:$0xff]   ;;  %v4926_v13 = vld [vmem:[#allocation5 + $0xc8] ss:$16 sps:$4 sm:$0xff]  }
  0x3c   : > { %503 = vmatprep.subr.bf16.mxu0 %v4904_v5  ;;  %546 = vmatprep.subr.bf16.mxu1 %v4924_v12  ;;  %v4930_v14 = vld [vmem:[#allocation5 + $0x80] ss:$16 sps:$4 sm:$0xff]   ;;  %v4932_v15 = vld [vmem:[#allocation5 + $0x64] ss:$16 sps:$4 sm:$0xff]   ;;  %v4934_v16 = vld [vmem:[#allocation5 + $0xac] ss:$16 sps:$4 sm:$0xff]  }
  0x3d   : > { %v4938_v17 = vld [vmem:[#allocation5 + $0xa8] ss:$16 sps:$4 sm:$0xff]   ;;  %v4941_v18 = vld [vmem:[#allocation5 + $0x8c] ss:$16 sps:$4 sm:$0xff]   ;;  %v4944_v19 = vld [vmem:[#allocation5 + $0x60] ss:$16 sps:$4 sm:$0xff]  }
  0x3e   : > { %v4947_v20 = vld [vmem:[#allocation5 + $0x44] ss:$16 sps:$4 sm:$0xff]   ;;  %v4950_v21 = vld [vmem:[#allocation5 + $0x88] ss:$16 sps:$4 sm:$0xff]   ;;  %v4953_v22 = vld [vmem:[#allocation5 + $0x6c] ss:$16 sps:$4 sm:$0xff]  }
  0x3f   : > { %504 = vmatpush1.bf16.msra.mxu0 %v4907_v6  ;;  %547 = vmatpush1.bf16.msra.mxu1 %v4926_v13  ;;  %v4956_v23 = vld [vmem:[#allocation5 + $0x40] ss:$16 sps:$4 sm:$0xff]   ;;  %v4959_v24 = vld [vmem:[#allocation5 + $0x24] ss:$16 sps:$4 sm:$0xff]   ;;  %v4962_v25 = vld [vmem:[#allocation5 + $0x68] ss:$16 sps:$4 sm:$0xff]  }
  0x40   : > { %505 = vmatprep.subr.bf16.mxu0 %v4910_v7  ;;  %548 = vmatprep.subr.bf16.mxu1 %v4934_v16  ;;  %v4964_v26 = vld [vmem:[#allocation5 + $0x20] ss:$16 sps:$4 sm:$0xff]   ;;  %v4967_v27 = vld [vmem:[#allocation5 + $0x4c] ss:$16 sps:$4 sm:$0xff]   ;;  %v4969_v28 = vld [vmem:[#allocation5 + $0x4] ss:$16 sps:$4 sm:$0xff]  }
  0x41   : > { %v4971_v29 = vld [vmem:[#allocation5 + $0x48] ss:$16 sps:$4 sm:$0xff]   ;;  %v4974_v30 = vld [vmem:[#allocation5 + $0x2c] ss:$16 sps:$4 sm:$0xff]   ;;  %v4978_v31 = vld [vmem:[#allocation5] ss:$16 sps:$4 sm:$0xff]  }
  0x42   : > { %v4981_v32 = vld [vmem:[#allocation5 + $0x28] ss:$16 sps:$4 sm:$0xff]   ;;  %v4984_v33 = vld [vmem:[#allocation5 + $0xc] ss:$16 sps:$4 sm:$0xff]   ;;  %s4153_s30 = sshll.u32 %s5667_s29, 9 }
  0x43   : > { %506 = vmatpush1.bf16.msra.mxu0 %v4917_v10  ;;  %549 = vmatpush1.bf16.msra.mxu1 %v4938_v17  ;;  %v4989_v35 = vld [vmem:[#allocation5 + $0x8] ss:$16 sps:$4 sm:$0xff]   ;;  %s5032_s5 = scalar_lea.vmem [#allocation4], %s4153_s30 }
  0x44   : > { %507 = vmatprep.subr.bf16.mxu0 %v4921_v11  ;;  %550 = vmatprep.subr.bf16.mxu1 %v4941_v18  ;;  %v295_v36 = vld [vmem:[%s5032_s5] sm:$0xff]  ;;  %v296_v38 = vld [vmem:[%s5032_s5 + $0x8] sm:$0xff]  ;;  %v298_v55 = vld [vmem:[%s5032_s5 + $0x18] sm:$0xff] }
  0x45   : > { %v299_v41 = vld [vmem:[%s5032_s5 + $0x20] sm:$0xff]  ;;  %v300_v45 = vld [vmem:[%s5032_s5 + $0x28] sm:$0xff]  ;;  %v297_v56 = vld [vmem:[%s5032_s5 + $0x10] sm:$0xff] }
  0x46   : > { %v302_v57 = vld [vmem:[%s5032_s5 + $0x38] sm:$0xff]  ;;  %v301_v1 = vld [vmem:[%s5032_s5 + $0x30] sm:$0xff] }
  0x47   : > { %508 = vmatpush1.bf16.msra.mxu0 %v4930_v14  ;;  %551 = vmatpush1.bf16.msra.mxu1 %v4950_v21 }
  0x48   : > { %509 = vmatprep.subr.bf16.mxu0 %v4932_v15  ;;  %552 = vmatprep.subr.bf16.mxu1 %v4953_v22 }
  0x4b   : > { %510 = vmatpush1.bf16.msra.mxu0 %v4944_v19  ;;  %553 = vmatpush1.bf16.msra.mxu1 %v4962_v25 }
  0x4c   : > { %511 = vmatprep.subr.bf16.mxu0 %v4947_v20  ;;  %554 = vmatprep.subr.bf16.mxu1 %v4967_v27 }
  0x4f   : > { %512 = vmatpush1.bf16.msra.mxu0 %v4956_v23  ;;  %555 = vmatpush1.bf16.msra.mxu1 %v4971_v29 }
  0x50   : > { %513 = vmatprep.subr.bf16.mxu0 %v4959_v24  ;;  %556 = vmatprep.subr.bf16.mxu1 %v4974_v30 }
  0x53   : > { %514 = vmatpush1.bf16.msra.mxu0 %v4964_v26  ;;  %557 = vmatpush1.bf16.msra.mxu1 %v4981_v32 }
  0x54   : > { %515 = vmatprep.subr.bf16.mxu0 %v4969_v28  ;;  %558 = vmatprep.subr.bf16.mxu1 %v4984_v33 }
  0x57   : > { %516 = vmatpush1.bf16.msra.mxu0 %v4978_v31  ;;  %559 = vmatpush1.bf16.msra.mxu1 %v4989_v35 }
  0x58   : > { %856 = vmatprep.subr.bf16.mxu0 %v4897_v2  ;;  %899 = vmatprep.subr.bf16.mxu1 %v4912_v8 }
  0x5a   : > { %534 = vmatmul.mubr.bf16.vlgmr.msra.gmra.mxu0 %v4338_v34  ;;  %577 = vmatmul.mubr.bf16.vlgmr.msra.gmra.mxu1 %v4338_v34 }
  0x5b   : > { %857 = vmatpush1.bf16.msra.mxu0 %v4899_v3  ;;  %888 = vmatprep.mubr.bf16.mxu0 %v4786_v4 }
  0x5c   : > { %858 = vmatprep.subr.bf16.mxu0 %v4904_v5  ;;  %900 = vmatpush1.bf16.msra.mxu1 %v4914_v9 }
  0x5d   : > { %901 = vmatprep.subr.bf16.mxu1 %v4924_v12  ;;  %931 = vmatprep.mubr.bf16.mxu1 %v4786_v4 }
  0x5f   : > { %859 = vmatpush1.bf16.msra.mxu0 %v4907_v6 }
  0x60   : > { %860 = vmatprep.subr.bf16.mxu0 %v4910_v7  ;;  %902 = vmatpush1.bf16.msra.mxu1 %v4926_v13 }
  0x61   : > { %903 = vmatprep.subr.bf16.mxu1 %v4934_v16 }
  0x63   : > { %861 = vmatpush1.bf16.msra.mxu0 %v4917_v10 }
  0x64   : > { %862 = vmatprep.subr.bf16.mxu0 %v4921_v11  ;;  %904 = vmatpush1.bf16.msra.mxu1 %v4938_v17 }
  0x65   : > { %905 = vmatprep.subr.bf16.mxu1 %v4941_v18 }
  0x67   : > { %863 = vmatpush1.bf16.msra.mxu0 %v4930_v14 }
  0x68   : > { %864 = vmatprep.subr.bf16.mxu0 %v4932_v15  ;;  %906 = vmatpush1.bf16.msra.mxu1 %v4950_v21 }
  0x69   : > { %907 = vmatprep.subr.bf16.mxu1 %v4953_v22 }
  0x6b   : > { %865 = vmatpush1.bf16.msra.mxu0 %v4944_v19 }
  0x6c   : > { %866 = vmatprep.subr.bf16.mxu0 %v4947_v20  ;;  %908 = vmatpush1.bf16.msra.mxu1 %v4962_v25 }
  0x6d   : > { %909 = vmatprep.subr.bf16.mxu1 %v4967_v27 }
  0x6f   : > { %867 = vmatpush1.bf16.msra.mxu0 %v4956_v23 }
  0x70   : > { %868 = vmatprep.subr.bf16.mxu0 %v4959_v24  ;;  %910 = vmatpush1.bf16.msra.mxu1 %v4971_v29 }
  0x71   : > { %911 = vmatprep.subr.bf16.mxu1 %v4974_v30 }
  0x73   : > { %869 = vmatpush1.bf16.msra.mxu0 %v4964_v26 }
  0x74   : > { %870 = vmatprep.subr.bf16.mxu0 %v4969_v28  ;;  %912 = vmatpush1.bf16.msra.mxu1 %v4981_v32 }
  0x75   : > { %913 = vmatprep.subr.bf16.mxu1 %v4984_v33 }
  0x77   : > { %871 = vmatpush1.bf16.msra.mxu0 %v4978_v31 }
  0x78   : > { %1212 = vmatprep.subr.bf16.mxu0 %v4897_v2  ;;  %914 = vmatpush1.bf16.msra.mxu1 %v4989_v35 }
  0x79   : > { %1255 = vmatprep.subr.bf16.mxu1 %v4912_v8 }
 0x11a   : > { %v535_v37 = vpop.f32.mrf.mxu0  ;;  %v578_v48 = vpop.f32.mrf.mxu1 }
 0x11b   : > { %v587_v39 = vadd.f32 %v535_v37, %v295_v36  ;;  %v589_v60 = vadd.f32 %v578_v48, %v297_v56 }
 0x11c   : > { %v537_v40 = vpop.f32.mrf.mxu0  ;;  %v580_v52 = vpop.f32.mrf.mxu1 }
 0x11d   : > { %v3759_v42 = vmul.f32 -1.442695, %v587_v39  ;;  %v588_v43 = vadd.f32 %v537_v40, %v296_v38  ;;  %v590_v59 = vadd.f32 %v580_v52, %v298_v55 }
 0x11e   : > { %v539_v44 = vpop.f32.mrf.mxu0  ;;  %v582_v54 = vpop.f32.mrf.mxu1 }
 0x11f   : > { %4411 = vpow2.f32 %v3759_v42  ;;  %v3761_v46 = vmul.f32 -1.442695, %v588_v43  ;;  %v591_v47 = vadd.f32 %v539_v44, %v299_v41  ;;  %v3763_v63 = vmul.f32 -1.442695, %v590_v59 }
 0x120   : > { %v541_v49 = vpop.f32.mrf.mxu0  ;;  %v584_v58 = vpop.f32.mrf.mxu1  ;;  %v593_v39 = vadd.f32 %v582_v54, %v301_v1 }
 0x121   : > { %4413 = vpow2.f32 %v3761_v46  ;;  %v3760_v50 = vmul.f32 -1.442695, %v591_v47  ;;  %v592_v51 = vadd.f32 %v541_v49, %v300_v45  ;;  %v594_v61 = vadd.f32 %v584_v58, %v302_v57  ;;  %v287_v45 = vld [vmem:[#allocation3] sm:$0xff] }
 0x123   : > { %4415 = vpow2.f32 %v3760_v50  ;;  %v3762_v53 = vmul.f32 -1.442695, %v592_v51  ;;  %v3764_v36 = vmul.f32 -1.442695, %v594_v61 }
 0x125   : > { %4417 = vpow2.f32 %v3762_v53  ;;  %v288_v53 = vld [vmem:[#allocation3 + $0x8] sm:$0xff] }
 0x126   : > { %4419 = vtanh.f32 %v589_v60 }
 0x12c   : > { %v4412_v62 = vpop.eup %4411 }
 0x12d   : > { %v601_v0 = vadd.f32 1.0, %v4412_v62 }
 0x12e   : > { %v4414_v34 = vpop.eup %4413 }
 0x12f   : > { %4421 = vrcp.f32 %v601_v0  ;;  %v613_v37 = vadd.f32 1.0, %v4414_v34 }
 0x130   : > { %v4416_v38 = vpop.eup %4415  ;;  %4423 = vpow2.f32 %v3763_v63 }
 0x131   : > { %4425 = vrcp.f32 %v613_v37  ;;  %v602_v40 = vadd.f32 1.0, %v4416_v38 }
 0x132   : > { %v4418_v41 = vpop.eup %4417  ;;  %4427 = vpow2.f32 %v3764_v36 }
 0x133   : > { %4429 = vrcp.f32 %v602_v40  ;;  %v614_v42 = vadd.f32 1.0, %v4418_v41  ;;  %v4420_v43 = vpop.eup %4419 }
 0x134   : > { %4431 = vtanh.f32 %v593_v39 }
 0x135   : > { %4433 = vrcp.f32 %v614_v42 }
 0x13c   : > { %v4422_v44 = vpop.eup %4421 }
 0x13d   : > { %v4424_v46 = vpop.eup %4423  ;;  %v635_v50 = vmul.f32 %v4422_v44, %v4420_v43  ;;  %v3770_v44 = vld [vmem:[%s5032_s5 + $0x58] sm:$0xff] }
 0x13e   : > { %v4426_v47 = vpop.eup %4425  ;;  %v627_v52 = vadd.f32 1.0, %v4424_v46  ;;  %v3774_v46 = vld [vmem:[%s5032_s5 + $0x78] sm:$0xff] }
 0x13f   : > { %v4428_v48 = vpop.eup %4427  ;;  %v633_v49 = vmul.f32 %v4426_v47, %v287_v45  ;;  %v3769_v45 = vld [vmem:[%s5032_s5 + $0x50] sm:$0xff] }
 0x140   : > { %v4430_v51 = vpop.eup %4429  ;;  %v628_v57 = vadd.f32 1.0, %v4428_v48  ;;  %4435 = vrcp.f32 %v627_v52 }
 0x141   : > { %v4432_v54 = vpop.eup %4431  ;;  %v5042_v55 = vadd.f32 %v635_v50, %v633_v49 }
 0x142   : > { %v4434_v56 = vpop.eup %4433  ;;  %v636_v59 = vmul.f32 %v4432_v54, %v4430_v51  ;;  %v3773_v54 = vld [vmem:[%s5032_s5 + $0x70] sm:$0xff] }
 0x143   : > { %v634_v58 = vmul.f32 %v4434_v56, %v288_v53  ;;  %4437 = vtanh.f32 %v5042_v55 }
 0x144   : > { %4439 = vrcp.f32 %v628_v57 }
 0x145   : > { %v5045_v60 = vadd.f32 %v636_v59, %v634_v58 }
 0x147   : > { %4441 = vtanh.f32 %v5045_v60 }
 0x14d   : > { %v4436_v61 = vpop.eup %4435 }
 0x150   : > { %v4438_v62 = vpop.eup %4437 }
 0x151   : > { %v4440_v63 = vpop.eup %4439  ;;  %v641_v1 = vmul.f32 %v4438_v62, %v4436_v61 }
 0x154   : > { %v4442_v0 = vpop.eup %4441 }
 0x155   : > { %v642_v34 = vmul.f32 %v4442_v0, %v4440_v63 }
 0x157   : > { %v643_v36 = vpack.c.bf16 %v642_v34, %v641_v1 }
 0x159   : > { %4176 = vst [vmem:[%s4893_s21] sm:$0xff] %v643_v36   ;;  %889 = vmatmul.mubr.bf16.vlgmr.msra.gmra.mxu0 %v643_v36  ;;  %932 = vmatmul.mubr.bf16.vlgmr.msra.gmra.mxu1 %v643_v36 }
 0x15a   : > { %1213 = vmatpush1.bf16.msra.mxu0 %v4899_v3  ;;  %1256 = vmatpush1.bf16.msra.mxu1 %v4914_v9 }
 0x15b   : > { %1214 = vmatprep.subr.bf16.mxu0 %v4904_v5  ;;  %1257 = vmatprep.subr.bf16.mxu1 %v4924_v12 }
 0x15c   : > { %1244 = vmatprep.mubr.bf16.mxu0 %v4786_v4  ;;  %1287 = vmatprep.mubr.bf16.mxu1 %v4786_v4 }
 0x15e   : > { %1215 = vmatpush1.bf16.msra.mxu0 %v4907_v6  ;;  %1258 = vmatpush1.bf16.msra.mxu1 %v4926_v13 }
 0x15f   : > { %1216 = vmatprep.subr.bf16.mxu0 %v4910_v7  ;;  %1259 = vmatprep.subr.bf16.mxu1 %v4934_v16 }
 0x162   : > { %1217 = vmatpush1.bf16.msra.mxu0 %v4917_v10  ;;  %1260 = vmatpush1.bf16.msra.mxu1 %v4938_v17 }
 0x163   : > { %1218 = vmatprep.subr.bf16.mxu0 %v4921_v11  ;;  %1261 = vmatprep.subr.bf16.mxu1 %v4941_v18  ;;  %v3767_v11 = vld [vmem:[%s5032_s5 + $0x40] sm:$0xff] }
 0x166   : > { %1219 = vmatpush1.bf16.msra.mxu0 %v4930_v14  ;;  %1262 = vmatpush1.bf16.msra.mxu1 %v4950_v21 }
 0x167   : > { %1220 = vmatprep.subr.bf16.mxu0 %v4932_v15  ;;  %1263 = vmatprep.subr.bf16.mxu1 %v4953_v22  ;;  %v3768_v15 = vld [vmem:[%s5032_s5 + $0x48] sm:$0xff] }
 0x16a   : > { %1221 = vmatpush1.bf16.msra.mxu0 %v4944_v19  ;;  %1264 = vmatpush1.bf16.msra.mxu1 %v4962_v25 }
 0x16b   : > { %1222 = vmatprep.subr.bf16.mxu0 %v4947_v20  ;;  %1265 = vmatprep.subr.bf16.mxu1 %v4967_v27 }
 0x16e   : > { %1223 = vmatpush1.bf16.msra.mxu0 %v4956_v23  ;;  %1266 = vmatpush1.bf16.msra.mxu1 %v4971_v29 }
 0x16f   : > { %1224 = vmatprep.subr.bf16.mxu0 %v4959_v24  ;;  %1267 = vmatprep.subr.bf16.mxu1 %v4974_v30  ;;  %v3771_v24 = vld [vmem:[%s5032_s5 + $0x60] sm:$0xff] }
 0x172   : > { %1225 = vmatpush1.bf16.msra.mxu0 %v4964_v26  ;;  %1268 = vmatpush1.bf16.msra.mxu1 %v4981_v32 }
 0x173   : > { %1226 = vmatprep.subr.bf16.mxu0 %v4969_v28  ;;  %1269 = vmatprep.subr.bf16.mxu1 %v4984_v33 }
 0x176   : > { %1227 = vmatpush1.bf16.msra.mxu0 %v4978_v31  ;;  %1270 = vmatpush1.bf16.msra.mxu1 %v4989_v35  ;;  %v3772_v31 = vld [vmem:[%s5032_s5 + $0x68] sm:$0xff] }
 0x177   : > { %1568 = vmatprep.subr.bf16.mxu0 %v4897_v2  ;;  %1611 = vmatprep.subr.bf16.mxu1 %v4912_v8 }
 0x219   : > { %v890_v14 = vpop.f32.mrf.mxu0  ;;  %v933_v20 = vpop.f32.mrf.mxu1 }
 0x21a   : > { %v942_v19 = vadd.f32 %v3767_v11, %v890_v14  ;;  %v944_v49 = vadd.f32 %v3769_v45, %v933_v20 }
 0x21b   : > { %v892_v23 = vpop.f32.mrf.mxu0  ;;  %v935_v39 = vpop.f32.mrf.mxu1 }
 0x21c   : > { %v3807_v26 = vmul.f32 -1.442695, %v942_v19  ;;  %v943_v28 = vadd.f32 %v3768_v15, %v892_v23  ;;  %v945_v48 = vadd.f32 %v3770_v44, %v935_v39 }
 0x21d   : > { %v894_v37 = vpop.f32.mrf.mxu0  ;;  %v937_v42 = vpop.f32.mrf.mxu1 }
 0x21e   : > { %4443 = vpow2.f32 %v3807_v26  ;;  %v3809_v38 = vmul.f32 -1.442695, %v943_v28  ;;  %v946_v2 = vadd.f32 %v3771_v24, %v894_v37  ;;  %v3811_v52 = vmul.f32 -1.442695, %v945_v48 }
 0x21f   : > { %v896_v40 = vpop.f32.mrf.mxu0  ;;  %v939_v47 = vpop.f32.mrf.mxu1  ;;  %v948_v61 = vadd.f32 %v3773_v54, %v937_v42  ;;  %v3824_v54 = vld [vmem:[%s5032_s5 + $0xb8] sm:$0xff] }
 0x220   : > { %4445 = vpow2.f32 %v3809_v38  ;;  %v3808_v8 = vmul.f32 -1.442695, %v946_v2  ;;  %v947_v41 = vadd.f32 %v3772_v31, %v896_v40  ;;  %v949_v50 = vadd.f32 %v3774_v46, %v939_v47 }
 0x222   : > { %4447 = vpow2.f32 %v3808_v8  ;;  %v3810_v43 = vmul.f32 -1.442695, %v947_v41  ;;  %v3812_v57 = vmul.f32 -1.442695, %v949_v50 }
 0x224   : > { %4449 = vpow2.f32 %v3810_v43 }
 0x225   : > { %4451 = vtanh.f32 %v944_v49 }
 0x22b   : > { %v4444_v51 = vpop.eup %4443 }
 0x22c   : > { %v956_v53 = vadd.f32 1.0, %v4444_v51 }
 0x22d   : > { %v4446_v56 = vpop.eup %4445 }
 0x22e   : > { %4453 = vrcp.f32 %v956_v53  ;;  %v968_v58 = vadd.f32 1.0, %v4446_v56  ;;  %v3819_v53 = vld [vmem:[%s5032_s5 + $0x90] sm:$0xff] }
 0x22f   : > { %v4448_v59 = vpop.eup %4447  ;;  %4455 = vpow2.f32 %v3811_v52  ;;  %v3820_v52 = vld [vmem:[%s5032_s5 + $0x98] sm:$0xff] }
 0x230   : > { %4457 = vrcp.f32 %v968_v58  ;;  %v957_v62 = vadd.f32 1.0, %v4448_v59 }
 0x231   : > { %v4450_v63 = vpop.eup %4449  ;;  %4459 = vpow2.f32 %v3812_v57 }
 0x232   : > { %4461 = vrcp.f32 %v957_v62  ;;  %v969_v0 = vadd.f32 1.0, %v4450_v63  ;;  %v4452_v1 = vpop.eup %4451 }
 0x233   : > { %4463 = vtanh.f32 %v948_v61 }
 0x234   : > { %4465 = vrcp.f32 %v969_v0  ;;  %v3823_v0 = vld [vmem:[%s5032_s5 + $0xb0] sm:$0xff] }
 0x23b   : > { %v4454_v34 = vpop.eup %4453 }
 0x23c   : > { %v4456_v36 = vpop.eup %4455  ;;  %v990_v15 = vmul.f32 %v4454_v34, %v4452_v1 }
 0x23d   : > { %v4458_v11 = vpop.eup %4457  ;;  %v982_v23 = vadd.f32 1.0, %v4456_v36 }
 0x23e   : > { %v4460_v14 = vpop.eup %4459  ;;  %v988_v19 = vmul.f32 %v4458_v11, %v5042_v55 }
 0x23f   : > { %v4462_v20 = vpop.eup %4461  ;;  %v983_v37 = vadd.f32 1.0, %v4460_v14  ;;  %4467 = vrcp.f32 %v982_v23 }
 0x240   : > { %v4464_v24 = vpop.eup %4463  ;;  %v5092_v26 = vadd.f32 %v990_v15, %v988_v19 }
 0x241   : > { %v4466_v28 = vpop.eup %4465  ;;  %v991_v31 = vmul.f32 %v4464_v24, %v4462_v20 }
 0x242   : > { %v989_v38 = vmul.f32 %v4466_v28, %v5045_v60  ;;  %4469 = vtanh.f32 %v5092_v26  ;;  %v3822_v60 = vld [vmem:[%s5032_s5 + $0xa8] sm:$0xff] }
 0x243   : > { %4471 = vrcp.f32 %v983_v37 }
 0x244   : > { %v5095_v39 = vadd.f32 %v991_v31, %v989_v38 }
 0x246   : > { %4473 = vtanh.f32 %v5095_v39 }
 0x24c   : > { %v4468_v55 = vpop.eup %4467 }
 0x24f   : > { %v4470_v2 = vpop.eup %4469 }
 0x250   : > { %v4472_v40 = vpop.eup %4471  ;;  %v996_v41 = vmul.f32 %v4470_v2, %v4468_v55 }
 0x253   : > { %v4474_v8 = vpop.eup %4473 }
 0x254   : > { %v997_v42 = vmul.f32 %v4474_v8, %v4472_v40 }
 0x256   : > { %v998_v43 = vpack.c.bf16 %v997_v42, %v996_v41 }
 0x258   : > { %4217 = vst [vmem:[%s4893_s21 + $0x8] sm:$0xff] %v998_v43   ;;  %1245 = vmatmul.mubr.bf16.vlgmr.msra.gmra.mxu0 %v998_v43  ;;  %1288 = vmatmul.mubr.bf16.vlgmr.msra.gmra.mxu1 %v998_v43 }
 0x259   : > { %1569 = vmatpush1.bf16.msra.mxu0 %v4899_v3  ;;  %1612 = vmatpush1.bf16.msra.mxu1 %v4914_v9  ;;  %v5122_v3 = vld [vmem:[#allocation5 + $0x80] ss:$16 sps:$4 sm:$0xff]   ;;  %v5133_v9 = vld [vmem:[#allocation5 + $0x44] ss:$16 sps:$4 sm:$0xff]  }
 0x25a   : > { %1570 = vmatprep.subr.bf16.mxu0 %v4904_v5  ;;  %1613 = vmatprep.subr.bf16.mxu1 %v4924_v12  ;;  %v5124_v5 = vld [vmem:[#allocation5 + $0x84] ss:$16 sps:$4 sm:$0xff]  }
 0x25b   : > { %1600 = vmatprep.mubr.bf16.mxu0 %v4786_v4  ;;  %1643 = vmatprep.mubr.bf16.mxu1 %v4786_v4  ;;  %v5139_v12 = vld [vmem:[#allocation5 + $0x24] ss:$16 sps:$4 sm:$0xff]  }
 0x25d   : > { %1571 = vmatpush1.bf16.msra.mxu0 %v4907_v6  ;;  %1614 = vmatpush1.bf16.msra.mxu1 %v4926_v13  ;;  %v5126_v6 = vld [vmem:[#allocation5 + $0x64] ss:$16 sps:$4 sm:$0xff]   ;;  %v5142_v13 = vld [vmem:[#allocation5 + $0x20] ss:$16 sps:$4 sm:$0xff]  }
 0x25e   : > { %1572 = vmatprep.subr.bf16.mxu0 %v4910_v7  ;;  %1615 = vmatprep.subr.bf16.mxu1 %v4934_v16  ;;  %v5130_v7 = vld [vmem:[#allocation5 + $0x60] ss:$16 sps:$4 sm:$0xff]   ;;  %v5145_v16 = vld [vmem:[#allocation5 + $0x4] ss:$16 sps:$4 sm:$0xff]  }
 0x261   : > { %1573 = vmatpush1.bf16.msra.mxu0 %v4917_v10  ;;  %1616 = vmatpush1.bf16.msra.mxu1 %v4938_v17  ;;  %v5136_v10 = vld [vmem:[#allocation5 + $0x40] ss:$16 sps:$4 sm:$0xff]  }
 0x262   : > { %1617 = vmatprep.subr.bf16.mxu1 %v4941_v18  ;;  %1574 = vmatprep.subr.bf16.mxu0 %v5124_v5  ;;  %v5148_v17 = vld [vmem:[#allocation5] ss:$16 sps:$4 sm:$0xff]   ;;  %v3817_v18 = vld [vmem:[%s5032_s5 + $0x80] sm:$0xff] }
 0x265   : > { %1618 = vmatpush1.bf16.msra.mxu1 %v4950_v21  ;;  %1575 = vmatpush1.bf16.msra.mxu0 %v5122_v3 }
 0x266   : > { %1619 = vmatprep.subr.bf16.mxu1 %v4953_v22  ;;  %1576 = vmatprep.subr.bf16.mxu0 %v5126_v6  ;;  %v3818_v22 = vld [vmem:[%s5032_s5 + $0x88] sm:$0xff] }
 0x269   : > { %1620 = vmatpush1.bf16.msra.mxu1 %v4962_v25  ;;  %1577 = vmatpush1.bf16.msra.mxu0 %v5130_v7 }
 0x26a   : > { %1621 = vmatprep.subr.bf16.mxu1 %v4967_v27  ;;  %1578 = vmatprep.subr.bf16.mxu0 %v5133_v9 }
 0x26d   : > { %1622 = vmatpush1.bf16.msra.mxu1 %v4971_v29  ;;  %1579 = vmatpush1.bf16.msra.mxu0 %v5136_v10 }
 0x26e   : > { %1623 = vmatprep.subr.bf16.mxu1 %v4974_v30  ;;  %1580 = vmatprep.subr.bf16.mxu0 %v5139_v12  ;;  %v3821_v30 = vld [vmem:[%s5032_s5 + $0xa0] sm:$0xff] }
 0x271   : > { %1624 = vmatpush1.bf16.msra.mxu1 %v4981_v32  ;;  %1581 = vmatpush1.bf16.msra.mxu0 %v5142_v13 }
 0x272   : > { %1625 = vmatprep.subr.bf16.mxu1 %v4984_v33  ;;  %1582 = vmatprep.subr.bf16.mxu0 %v5145_v16 }
 0x275   : > { %1626 = vmatpush1.bf16.msra.mxu1 %v4989_v35  ;;  %1583 = vmatpush1.bf16.msra.mxu0 %v5148_v17 }
 0x318   : > { %v1246_v21 = vpop.f32.mrf.mxu0  ;;  %v1289_v27 = vpop.f32.mrf.mxu1 }
 0x319   : > { %v1298_v25 = vadd.f32 %v3817_v18, %v1246_v21  ;;  %v1300_v58 = vadd.f32 %v3819_v53, %v1289_v27  ;;  %v5207_v53 = vld [vmem:[#allocation5 + $0x88] ss:$16 sps:$4 sm:$0xff]  }
 0x31a   : > { %v1248_v29 = vpop.f32.mrf.mxu0  ;;  %v1291_v45 = vpop.f32.mrf.mxu1 }
 0x31b   : > { %v3857_v32 = vmul.f32 -1.442695, %v1298_v25  ;;  %v1299_v33 = vadd.f32 %v3818_v22, %v1248_v29  ;;  %v1301_v57 = vadd.f32 %v3820_v52, %v1291_v45  ;;  %v5183_v45 = vld [vmem:[#allocation5 + $0xc4] ss:$16 sps:$4 sm:$0xff]   ;;  %v5201_v52 = vld [vmem:[#allocation5 + $0xa8] ss:$16 sps:$4 sm:$0xff]  }
 0x31c   : > { %v1250_v35 = vpop.f32.mrf.mxu0  ;;  %v1293_v50 = vpop.f32.mrf.mxu1 }
 0x31d   : > { %4475 = vpow2.f32 %v3857_v32  ;;  %v3859_v44 = vmul.f32 -1.442695, %v1299_v33  ;;  %v1302_v46 = vadd.f32 %v3821_v30, %v1250_v35  ;;  %v3861_v62 = vmul.f32 -1.442695, %v1301_v57  ;;  %v5173_v35 = vld [vmem:[#allocation5 + $0xec] ss:$16 sps:$4 sm:$0xff]  }
 0x31e   : > { %v1252_v47 = vpop.f32.mrf.mxu0  ;;  %v1295_v56 = vpop.f32.mrf.mxu1  ;;  %v1304_v14 = vadd.f32 %v3823_v0, %v1293_v50  ;;  %1967 = vmatprep.subr.bf16.mxu1 %v5173_v35  ;;  %v5197_v50 = vld [vmem:[#allocation5 + $0xac] ss:$16 sps:$4 sm:$0xff]   ;;  %v5217_v57 = vld [vmem:[#allocation5 + $0x68] ss:$16 sps:$4 sm:$0xff]  }
 0x31f   : > { %4477 = vpow2.f32 %v3859_v44  ;;  %v3858_v48 = vmul.f32 -1.442695, %v1302_v46  ;;  %v1303_v49 = vadd.f32 %v3822_v60, %v1252_v47  ;;  %v1305_v59 = vadd.f32 %v3824_v54, %v1295_v56  ;;  %v5175_v60 = vld [vmem:[#allocation5 + $0xe0] ss:$16 sps:$4 sm:$0xff]   ;;  %v5177_v44 = vld [vmem:[#allocation5 + $0xe8] ss:$16 sps:$4 sm:$0xff]  }
 0x320   : > { %v5185_v46 = vld [vmem:[#allocation5 + $0xcc] ss:$16 sps:$4 sm:$0xff]   ;;  %v5187_v47 = vld [vmem:[#allocation5 + $0xc0] ss:$16 sps:$4 sm:$0xff]   ;;  %v5241_v0 = vld [vmem:[#allocation5 + $0x8] ss:$16 sps:$4 sm:$0xff]  }
 0x321   : > { %4479 = vpow2.f32 %v3858_v48  ;;  %v3860_v51 = vmul.f32 -1.442695, %v1303_v49  ;;  %v3862_v34 = vmul.f32 -1.442695, %v1305_v59  ;;  %v5189_v48 = vld [vmem:[#allocation5 + $0xc8] ss:$16 sps:$4 sm:$0xff]  }
 0x322   : > { %v5195_v49 = vld [vmem:[#allocation5 + $0xa4] ss:$16 sps:$4 sm:$0xff]   ;;  %v5209_v54 = vld [vmem:[#allocation5 + $0x8c] ss:$16 sps:$4 sm:$0xff]   ;;  %v5225_v59 = vld [vmem:[#allocation5 + $0x48] ss:$16 sps:$4 sm:$0xff]  }
 0x323   : > { %4481 = vpow2.f32 %v3860_v51  ;;  %v5199_v51 = vld [vmem:[#allocation5 + $0xa0] ss:$16 sps:$4 sm:$0xff]   ;;  %v5212_v56 = vld [vmem:[#allocation5 + $0x6c] ss:$16 sps:$4 sm:$0xff]  }
 0x324   : > { %4483 = vtanh.f32 %v1300_v58  ;;  %v5221_v58 = vld [vmem:[#allocation5 + $0x4c] ss:$16 sps:$4 sm:$0xff]  }
 0x32a   : > { %v4476_v61 = vpop.eup %4475 }
 0x32b   : > { %v1312_v63 = vadd.f32 1.0, %v4476_v61  ;;  %v5229_v61 = vld [vmem:[#allocation5 + $0x2c] ss:$16 sps:$4 sm:$0xff]  }
 0x32c   : > { %v4478_v1 = vpop.eup %4477 }
 0x32d   : > { %4485 = vrcp.f32 %v1312_v63  ;;  %v1324_v36 = vadd.f32 1.0, %v4478_v1  ;;  %v5237_v63 = vld [vmem:[#allocation5 + $0xc] ss:$16 sps:$4 sm:$0xff]  }
 0x32e   : > { %v4480_v11 = vpop.eup %4479  ;;  %4487 = vpow2.f32 %v3861_v62  ;;  %v5233_v62 = vld [vmem:[#allocation5 + $0x28] ss:$16 sps:$4 sm:$0xff]  }
 0x32f   : > { %4489 = vrcp.f32 %v1324_v36  ;;  %v1313_v15 = vadd.f32 1.0, %v4480_v11  ;;  %v3867_v1 = vld [vmem:[%s5032_s5 + $0xc0] sm:$0xff]  ;;  %v3868_v36 = vld [vmem:[%s5032_s5 + $0xc8] sm:$0xff] }
 0x330   : > { %v4482_v19 = vpop.eup %4481  ;;  %4491 = vpow2.f32 %v3862_v34 }
 0x331   : > { %4493 = vrcp.f32 %v1313_v15  ;;  %v1325_v20 = vadd.f32 1.0, %v4482_v19  ;;  %v4484_v23 = vpop.eup %4483  ;;  %v3871_v19 = vld [vmem:[%s5032_s5 + $0xe0] sm:$0xff] }
 0x332   : > { %4495 = vtanh.f32 %v1304_v14 }
 0x333   : > { %4497 = vrcp.f32 %v1325_v20 }
 0x33a   : > { %v4486_v24 = vpop.eup %4485 }
 0x33b   : > { %v4488_v28 = vpop.eup %4487  ;;  %v1346_v38 = vmul.f32 %v4486_v24, %v4484_v23 }
 0x33c   : > { %v4490_v37 = vpop.eup %4489  ;;  %v1338_v40 = vadd.f32 1.0, %v4488_v28  ;;  %v3872_v28 = vld [vmem:[%s5032_s5 + $0xe8] sm:$0xff] }
 0x33d   : > { %v4492_v31 = vpop.eup %4491  ;;  %v1344_v55 = vmul.f32 %v4490_v37, %v5092_v26 }
 0x33e   : > { %v4494_v2 = vpop.eup %4493  ;;  %v1339_v43 = vadd.f32 1.0, %v4492_v31  ;;  %4499 = vrcp.f32 %v1338_v40 }
 0x33f   : > { %v4496_v8 = vpop.eup %4495  ;;  %v5161_v41 = vadd.f32 %v1346_v38, %v1344_v55 }
 0x340   : > { %v4498_v42 = vpop.eup %4497  ;;  %v1347_v18 = vmul.f32 %v4496_v8, %v4494_v2 }
 0x341   : > { %v1345_v21 = vmul.f32 %v4498_v42, %v5095_v39  ;;  %4501 = vtanh.f32 %v5161_v41  ;;  %v5171_v39 = vld [vmem:[#allocation5 + $0xe4] ss:$16 sps:$4 sm:$0xff]  }
 0x342   : > { %4503 = vrcp.f32 %v1339_v43  ;;  %1924 = vmatprep.subr.bf16.mxu0 %v5171_v39  ;;  %v3870_v43 = vld [vmem:[%s5032_s5 + $0xd8] sm:$0xff] }
 0x343   : > { %v5164_v22 = vadd.f32 %v1347_v18, %v1345_v21  ;;  %v3869_v18 = vld [vmem:[%s5032_s5 + $0xd0] sm:$0xff]  ;;  %v3874_v21 = vld [vmem:[%s5032_s5 + $0xf8] sm:$0xff] }
 0x345   : > { %4505 = vtanh.f32 %v5164_v22 }
 0x34b   : > { %v4500_v26 = vpop.eup %4499 }
 0x34e   : > { %v4502_v25 = vpop.eup %4501 }
 0x34f   : > { %v4504_v27 = vpop.eup %4503  ;;  %v1352_v30 = vmul.f32 %v4502_v25, %v4500_v26 }
 0x352   : > { %v4506_v29 = vpop.eup %4505 }
 0x353   : > { %v1353_v32 = vmul.f32 %v4506_v29, %v4504_v27 }
 0x355   : > { %v1354_v33 = vpack.c.bf16 %v1353_v32, %v1352_v30 }
 0x357   : > { %4218 = vst [vmem:[%s4893_s21 + $0x10] sm:$0xff] %v1354_v33   ;;  %1601 = vmatmul.mubr.bf16.vlgmr.msra.gmra.mxu0 %v1354_v33  ;;  %1644 = vmatmul.mubr.bf16.vlgmr.msra.gmra.mxu1 %v1354_v33 }
 0x358   : > { %1956 = vmatprep.mubr.bf16.mxu0 %v4786_v4  ;;  %1999 = vmatprep.mubr.bf16.mxu1 %v4786_v4 }
 0x359   : > { %1925 = vmatpush1.bf16.msra.mxu0 %v5175_v60  ;;  %1968 = vmatpush1.bf16.msra.mxu1 %v5177_v44 }
 0x35a   : > { %1926 = vmatprep.subr.bf16.mxu0 %v5183_v45  ;;  %1969 = vmatprep.subr.bf16.mxu1 %v5185_v46 }
 0x35d   : > { %1927 = vmatpush1.bf16.msra.mxu0 %v5187_v47  ;;  %1970 = vmatpush1.bf16.msra.mxu1 %v5189_v48 }
 0x35e   : > { %1928 = vmatprep.subr.bf16.mxu0 %v5195_v49  ;;  %1971 = vmatprep.subr.bf16.mxu1 %v5197_v50 }
 0x361   : > { %1929 = vmatpush1.bf16.msra.mxu0 %v5199_v51  ;;  %1972 = vmatpush1.bf16.msra.mxu1 %v5201_v52 }
 0x362   : > { %1930 = vmatprep.subr.bf16.mxu0 %v5124_v5  ;;  %1973 = vmatprep.subr.bf16.mxu1 %v5209_v54 }
 0x365   : > { %1931 = vmatpush1.bf16.msra.mxu0 %v5122_v3  ;;  %1974 = vmatpush1.bf16.msra.mxu1 %v5207_v53 }
 0x366   : > { %1932 = vmatprep.subr.bf16.mxu0 %v5126_v6  ;;  %1975 = vmatprep.subr.bf16.mxu1 %v5212_v56 }
 0x369   : > { %1933 = vmatpush1.bf16.msra.mxu0 %v5130_v7  ;;  %1976 = vmatpush1.bf16.msra.mxu1 %v5217_v57 }
 0x36a   : > { %1934 = vmatprep.subr.bf16.mxu0 %v5133_v9  ;;  %1977 = vmatprep.subr.bf16.mxu1 %v5221_v58 }
 0x36d   : > { %1935 = vmatpush1.bf16.msra.mxu0 %v5136_v10  ;;  %1978 = vmatpush1.bf16.msra.mxu1 %v5225_v59 }
 0x36e   : > { %1936 = vmatprep.subr.bf16.mxu0 %v5139_v12  ;;  %1979 = vmatprep.subr.bf16.mxu1 %v5229_v61 }
 0x371   : > { %1937 = vmatpush1.bf16.msra.mxu0 %v5142_v13  ;;  %1980 = vmatpush1.bf16.msra.mxu1 %v5233_v62 }
 0x372   : > { %1938 = vmatprep.subr.bf16.mxu0 %v5145_v16  ;;  %1981 = vmatprep.subr.bf16.mxu1 %v5237_v63 }
 0x375   : > { %1939 = vmatpush1.bf16.msra.mxu0 %v5148_v17  ;;  %1982 = vmatpush1.bf16.msra.mxu1 %v5241_v0 }
 0x376   : > { %2280 = vmatprep.subr.bf16.mxu0 %v5171_v39  ;;  %2323 = vmatprep.subr.bf16.mxu1 %v5173_v35 }
 0x417   : > { %v1602_v34 = vpop.f32.mrf.mxu0  ;;  %v1645_v14 = vpop.f32.mrf.mxu1 }
 0x418   : > { %v1654_v11 = vadd.f32 %v3867_v1, %v1602_v34  ;;  %v1656_v27 = vadd.f32 %v3869_v18, %v1645_v14  ;;  %v3873_v1 = vld [vmem:[%s5032_s5 + $0xf0] sm:$0xff] }
 0x419   : > { %v1604_v15 = vpop.f32.mrf.mxu0  ;;  %v1647_v31 = vpop.f32.mrf.mxu1 }
 0x41a   : > { %v3907_v20 = vmul.f32 -1.442695, %v1654_v11  ;;  %v1655_v23 = vadd.f32 %v3868_v36, %v1604_v15  ;;  %v1657_v25 = vadd.f32 %v3870_v43, %v1647_v31 }
 0x41b   : > { %v1606_v24 = vpop.f32.mrf.mxu0  ;;  %v1649_v8 = vpop.f32.mrf.mxu1 }
 0x41c   : > { %4507 = vpow2.f32 %v3907_v20  ;;  %v3909_v37 = vmul.f32 -1.442695, %v1655_v23  ;;  %v1658_v38 = vadd.f32 %v3871_v19, %v1606_v24  ;;  %v3911_v32 = vmul.f32 -1.442695, %v1657_v25 }
 0x41d   : > { %v1608_v55 = vpop.f32.mrf.mxu0  ;;  %v1651_v26 = vpop.f32.mrf.mxu1  ;;  %v1660_v19 = vadd.f32 %v3873_v1, %v1649_v8 }
 0x41e   : > { %4509 = vpow2.f32 %v3909_v37  ;;  %v3908_v2 = vmul.f32 -1.442695, %v1658_v38  ;;  %v1659_v40 = vadd.f32 %v3872_v28, %v1608_v55  ;;  %v1661_v29 = vadd.f32 %v3874_v21, %v1651_v26 }
 0x420   : > { %4511 = vpow2.f32 %v3908_v2  ;;  %v3910_v42 = vmul.f32 -1.442695, %v1659_v40  ;;  %v3912_v36 = vmul.f32 -1.442695, %v1661_v29 }
 0x422   : > { %4513 = vpow2.f32 %v3910_v42 }
 0x423   : > { %4515 = vtanh.f32 %v1656_v27 }
 0x429   : > { %v4508_v30 = vpop.eup %4507 }
 0x42a   : > { %v1668_v33 = vadd.f32 1.0, %v4508_v30 }
 0x42b   : > { %v4510_v34 = vpop.eup %4509 }
 0x42c   : > { %4517 = vrcp.f32 %v1668_v33  ;;  %v1680_v11 = vadd.f32 1.0, %v4510_v34 }
 0x42d   : > { %v4512_v15 = vpop.eup %4511  ;;  %4519 = vpow2.f32 %v3911_v32 }
 0x42e   : > { %4521 = vrcp.f32 %v1680_v11  ;;  %v1669_v20 = vadd.f32 1.0, %v4512_v15  ;;  %v3918_v11 = vld [vmem:[%s5032_s5 + $0x108] sm:$0xff] }
 0x42f   : > { %v4514_v23 = vpop.eup %4513  ;;  %4523 = vpow2.f32 %v3912_v36 }
 0x430   : > { %4525 = vrcp.f32 %v1669_v20  ;;  %v1681_v24 = vadd.f32 1.0, %v4514_v23  ;;  %v4516_v14 = vpop.eup %4515  ;;  %v3921_v23 = vld [vmem:[%s5032_s5 + $0x120] sm:$0xff] }
 0x431   : > { %4527 = vtanh.f32 %v1660_v19 }
 0x432   : > { %4529 = vrcp.f32 %v1681_v24 }
 0x439   : > { %v4518_v28 = vpop.eup %4517 }
 0x43a   : > { %v4520_v37 = vpop.eup %4519  ;;  %v1702_v55 = vmul.f32 %v4518_v28, %v4516_v14 }
 0x43b   : > { %v4522_v31 = vpop.eup %4521  ;;  %v1694_v42 = vadd.f32 1.0, %v4520_v37  ;;  %v3922_v37 = vld [vmem:[%s5032_s5 + $0x128] sm:$0xff] }
 0x43c   : > { %v4524_v38 = vpop.eup %4523  ;;  %v1700_v2 = vmul.f32 %v4522_v31, %v5161_v41 }
 0x43d   : > { %v4526_v40 = vpop.eup %4525  ;;  %v1695_v21 = vadd.f32 1.0, %v4524_v38  ;;  %4531 = vrcp.f32 %v1694_v42 }
 0x43e   : > { %v4528_v43 = vpop.eup %4527  ;;  %v5258_v8 = vadd.f32 %v1702_v55, %v1700_v2 }
 0x43f   : > { %v4530_v18 = vpop.eup %4529  ;;  %v1703_v26 = vmul.f32 %v4528_v43, %v4526_v40 }
 0x440   : > { %v1701_v25 = vmul.f32 %v4530_v18, %v5164_v22  ;;  %4533 = vtanh.f32 %v5258_v8  ;;  %v3917_v22 = vld [vmem:[%s5032_s5 + $0x100] sm:$0xff] }
 0x441   : > { %4535 = vrcp.f32 %v1695_v21  ;;  %v3920_v21 = vld [vmem:[%s5032_s5 + $0x118] sm:$0xff] }
 0x442   : > { %v5261_v27 = vadd.f32 %v1703_v26, %v1701_v25  ;;  %v3919_v26 = vld [vmem:[%s5032_s5 + $0x110] sm:$0xff]  ;;  %v3924_v25 = vld [vmem:[%s5032_s5 + $0x138] sm:$0xff] }
 0x444   : > { %4537 = vtanh.f32 %v5261_v27 }
 0x44a   : > { %v4532_v41 = vpop.eup %4531 }
 0x44d   : > { %v4534_v29 = vpop.eup %4533 }
 0x44e   : > { %v4536_v30 = vpop.eup %4535  ;;  %v1708_v33 = vmul.f32 %v4534_v29, %v4532_v41 }
 0x451   : > { %v4538_v32 = vpop.eup %4537 }
 0x452   : > { %v1709_v1 = vmul.f32 %v4538_v32, %v4536_v30 }
 0x454   : > { %v1710_v34 = vpack.c.bf16 %v1709_v1, %v1708_v33 }
 0x456   : > { %4219 = vst [vmem:[%s4893_s21 + $0x18] sm:$0xff] %v1710_v34   ;;  %1957 = vmatmul.mubr.bf16.vlgmr.msra.gmra.mxu0 %v1710_v34  ;;  %2000 = vmatmul.mubr.bf16.vlgmr.msra.gmra.mxu1 %v1710_v34 }
 0x457   : > { %2281 = vmatpush1.bf16.msra.mxu0 %v5175_v60  ;;  %2324 = vmatpush1.bf16.msra.mxu1 %v5177_v44 }
 0x458   : > { %2282 = vmatprep.subr.bf16.mxu0 %v5183_v45  ;;  %2325 = vmatprep.subr.bf16.mxu1 %v5185_v46 }
 0x459   : > { %2312 = vmatprep.mubr.bf16.mxu0 %v4786_v4  ;;  %2355 = vmatprep.mubr.bf16.mxu1 %v4786_v4 }
 0x45b   : > { %2283 = vmatpush1.bf16.msra.mxu0 %v5187_v47  ;;  %2326 = vmatpush1.bf16.msra.mxu1 %v5189_v48 }
 0x45c   : > { %2284 = vmatprep.subr.bf16.mxu0 %v5195_v49  ;;  %2327 = vmatprep.subr.bf16.mxu1 %v5197_v50 }
 0x45f   : > { %2285 = vmatpush1.bf16.msra.mxu0 %v5199_v51  ;;  %2328 = vmatpush1.bf16.msra.mxu1 %v5201_v52 }
 0x460   : > { %2286 = vmatprep.subr.bf16.mxu0 %v5124_v5  ;;  %2329 = vmatprep.subr.bf16.mxu1 %v5209_v54 }
 0x463   : > { %2287 = vmatpush1.bf16.msra.mxu0 %v5122_v3  ;;  %2330 = vmatpush1.bf16.msra.mxu1 %v5207_v53 }
 0x464   : > { %2288 = vmatprep.subr.bf16.mxu0 %v5126_v6  ;;  %2331 = vmatprep.subr.bf16.mxu1 %v5212_v56 }
 0x467   : > { %2289 = vmatpush1.bf16.msra.mxu0 %v5130_v7  ;;  %2332 = vmatpush1.bf16.msra.mxu1 %v5217_v57 }
 0x468   : > { %2290 = vmatprep.subr.bf16.mxu0 %v5133_v9  ;;  %2333 = vmatprep.subr.bf16.mxu1 %v5221_v58 }
 0x46b   : > { %2291 = vmatpush1.bf16.msra.mxu0 %v5136_v10  ;;  %2334 = vmatpush1.bf16.msra.mxu1 %v5225_v59 }
 0x46c   : > { %2292 = vmatprep.subr.bf16.mxu0 %v5139_v12  ;;  %2335 = vmatprep.subr.bf16.mxu1 %v5229_v61 }
 0x46f   : > { %2293 = vmatpush1.bf16.msra.mxu0 %v5142_v13  ;;  %2336 = vmatpush1.bf16.msra.mxu1 %v5233_v62 }
 0x470   : > { %2294 = vmatprep.subr.bf16.mxu0 %v5145_v16  ;;  %2337 = vmatprep.subr.bf16.mxu1 %v5237_v63 }
 0x473   : > { %2295 = vmatpush1.bf16.msra.mxu0 %v5148_v17  ;;  %2338 = vmatpush1.bf16.msra.mxu1 %v5241_v0 }
 0x474   : > { %2636 = vmatprep.subr.bf16.mxu0 %v5171_v39  ;;  %2679 = vmatprep.subr.bf16.mxu1 %v5173_v35 }
 0x516   : > { %v1958_v36 = vpop.f32.mrf.mxu0  ;;  %v2001_v19 = vpop.f32.mrf.mxu1 }
 0x517   : > { %v2010_v15 = vadd.f32 %v3917_v22, %v1958_v36  ;;  %v2012_v30 = vadd.f32 %v3919_v26, %v2001_v19  ;;  %v3923_v22 = vld [vmem:[%s5032_s5 + $0x130] sm:$0xff] }
 0x518   : > { %v1960_v20 = vpop.f32.mrf.mxu0  ;;  %v2003_v38 = vpop.f32.mrf.mxu1 }
 0x519   : > { %v3957_v24 = vmul.f32 -1.442695, %v2010_v15  ;;  %v2011_v14 = vadd.f32 %v3918_v11, %v1960_v20  ;;  %v2013_v29 = vadd.f32 %v3920_v21, %v2003_v38 }
 0x51a   : > { %v1962_v28 = vpop.f32.mrf.mxu0  ;;  %v2005_v43 = vpop.f32.mrf.mxu1 }
 0x51b   : > { %4539 = vpow2.f32 %v3957_v24  ;;  %v3959_v31 = vmul.f32 -1.442695, %v2011_v14  ;;  %v2014_v55 = vadd.f32 %v3921_v23, %v1962_v28  ;;  %v3961_v1 = vmul.f32 -1.442695, %v2013_v29 }
 0x51c   : > { %v1964_v2 = vpop.f32.mrf.mxu0  ;;  %v2007_v41 = vpop.f32.mrf.mxu1  ;;  %v2016_v23 = vadd.f32 %v3923_v22, %v2005_v43 }
 0x51d   : > { %4541 = vpow2.f32 %v3959_v31  ;;  %v3958_v40 = vmul.f32 -1.442695, %v2014_v55  ;;  %v2015_v42 = vadd.f32 %v3922_v37, %v1964_v2  ;;  %v2017_v32 = vadd.f32 %v3924_v25, %v2007_v41 }
 0x51f   : > { %4543 = vpow2.f32 %v3958_v40  ;;  %v3960_v18 = vmul.f32 -1.442695, %v2015_v42  ;;  %v3962_v11 = vmul.f32 -1.442695, %v2017_v32 }
 0x521   : > { %4545 = vpow2.f32 %v3960_v18 }
 0x522   : > { %4547 = vtanh.f32 %v2012_v30 }
 0x528   : > { %v4540_v33 = vpop.eup %4539 }
 0x529   : > { %v2024_v34 = vadd.f32 1.0, %v4540_v33 }
 0x52a   : > { %v4542_v36 = vpop.eup %4541 }
 0x52b   : > { %4549 = vrcp.f32 %v2024_v34  ;;  %v2036_v15 = vadd.f32 1.0, %v4542_v36 }
 0x52c   : > { %v4544_v20 = vpop.eup %4543  ;;  %4551 = vpow2.f32 %v3961_v1 }
 0x52d   : > { %4553 = vrcp.f32 %v2036_v15  ;;  %v2025_v24 = vadd.f32 1.0, %v4544_v20 }
 0x52e   : > { %v4546_v14 = vpop.eup %4545  ;;  %4555 = vpow2.f32 %v3962_v11 }
 0x52f   : > { %4557 = vrcp.f32 %v2025_v24  ;;  %v2037_v28 = vadd.f32 1.0, %v4546_v14  ;;  %v4548_v19 = vpop.eup %4547 }
 0x530   : > { %4559 = vtanh.f32 %v2016_v23 }
 0x531   : > { %4561 = vrcp.f32 %v2037_v28  ;;  %v3970_v28 = vld [vmem:[%s5032_s5 + $0x158] sm:$0xff] }
 0x538   : > { %v4550_v37 = vpop.eup %4549 }
 0x539   : > { %v4552_v31 = vpop.eup %4551  ;;  %v2058_v2 = vmul.f32 %v4550_v37, %v4548_v19  ;;  %v3969_v19 = vld [vmem:[%s5032_s5 + $0x150] sm:$0xff]  ;;  %v3974_v37 = vld [vmem:[%s5032_s5 + $0x178] sm:$0xff] }
 0x53a   : > { %v4554_v38 = vpop.eup %4553  ;;  %v2050_v18 = vadd.f32 1.0, %v4552_v31 }
 0x53b   : > { %v4556_v55 = vpop.eup %4555  ;;  %v2056_v40 = vmul.f32 %v4554_v38, %v5258_v8 }
 0x53c   : > { %v4558_v42 = vpop.eup %4557  ;;  %v2051_v25 = vadd.f32 1.0, %v4556_v55  ;;  %4563 = vrcp.f32 %v2050_v18 }
 0x53d   : > { %v4560_v21 = vpop.eup %4559  ;;  %v5309_v43 = vadd.f32 %v2058_v2, %v2056_v40 }
 0x53e   : > { %v4562_v26 = vpop.eup %4561  ;;  %v2059_v41 = vmul.f32 %v4560_v21, %v4558_v42  ;;  %v3973_v21 = vld [vmem:[%s5032_s5 + $0x170] sm:$0xff] }
 0x53f   : > { %v2057_v29 = vmul.f32 %v4562_v26, %v5261_v27  ;;  %4565 = vtanh.f32 %v5309_v43 }
 0x540   : > { %4567 = vrcp.f32 %v2051_v25 }
 0x541   : > { %v5312_v30 = vadd.f32 %v2059_v41, %v2057_v29 }
 0x543   : > { %4569 = vtanh.f32 %v5312_v30 }
 0x549   : > { %v4564_v8 = vpop.eup %4563 }
 0x54c   : > { %v4566_v32 = vpop.eup %4565 }
 0x54d   : > { %v4568_v33 = vpop.eup %4567  ;;  %v2064_v34 = vmul.f32 %v4566_v32, %v4564_v8 }
 0x550   : > { %v4570_v1 = vpop.eup %4569 }
 0x551   : > { %v2065_v22 = vmul.f32 %v4570_v1, %v4568_v33 }
 0x553   : > { %v2066_v36 = vpack.c.bf16 %v2065_v22, %v2064_v34 }
 0x555   : > { %4220 = vst [vmem:[%s4893_s21 + $0x20] sm:$0xff] %v2066_v36   ;;  %2313 = vmatmul.mubr.bf16.vlgmr.msra.gmra.mxu0 %v2066_v36  ;;  %2356 = vmatmul.mubr.bf16.vlgmr.msra.gmra.mxu1 %v2066_v36 }
 0x556   : > { %2637 = vmatpush1.bf16.msra.mxu0 %v5175_v60  ;;  %2680 = vmatpush1.bf16.msra.mxu1 %v5177_v44 }
 0x557   : > { %2638 = vmatprep.subr.bf16.mxu0 %v5183_v45  ;;  %2681 = vmatprep.subr.bf16.mxu1 %v5185_v46 }
 0x558   : > { %2668 = vmatprep.mubr.bf16.mxu0 %v4786_v4  ;;  %2711 = vmatprep.mubr.bf16.mxu1 %v4786_v4 }
 0x55a   : > { %2639 = vmatpush1.bf16.msra.mxu0 %v5187_v47  ;;  %2682 = vmatpush1.bf16.msra.mxu1 %v5189_v48 }
 0x55b   : > { %2640 = vmatprep.subr.bf16.mxu0 %v5195_v49  ;;  %2683 = vmatprep.subr.bf16.mxu1 %v5197_v50 }
 0x55e   : > { %2641 = vmatpush1.bf16.msra.mxu0 %v5199_v51  ;;  %2684 = vmatpush1.bf16.msra.mxu1 %v5201_v52 }
 0x55f   : > { %2642 = vmatprep.subr.bf16.mxu0 %v5124_v5  ;;  %2685 = vmatprep.subr.bf16.mxu1 %v5209_v54 }
 0x562   : > { %2643 = vmatpush1.bf16.msra.mxu0 %v5122_v3  ;;  %2686 = vmatpush1.bf16.msra.mxu1 %v5207_v53  ;;  %v3967_v3 = vld [vmem:[%s5032_s5 + $0x140] sm:$0xff] }
 0x563   : > { %2644 = vmatprep.subr.bf16.mxu0 %v5126_v6  ;;  %2687 = vmatprep.subr.bf16.mxu1 %v5212_v56  ;;  %v3968_v6 = vld [vmem:[%s5032_s5 + $0x148] sm:$0xff] }
 0x566   : > { %2645 = vmatpush1.bf16.msra.mxu0 %v5130_v7  ;;  %2688 = vmatpush1.bf16.msra.mxu1 %v5217_v57 }
 0x567   : > { %2646 = vmatprep.subr.bf16.mxu0 %v5133_v9  ;;  %2689 = vmatprep.subr.bf16.mxu1 %v5221_v58 }
 0x56a   : > { %2647 = vmatpush1.bf16.msra.mxu0 %v5136_v10  ;;  %2690 = vmatpush1.bf16.msra.mxu1 %v5225_v59 }
 0x56b   : > { %2648 = vmatprep.subr.bf16.mxu0 %v5139_v12  ;;  %2691 = vmatprep.subr.bf16.mxu1 %v5229_v61  ;;  %v3971_v12 = vld [vmem:[%s5032_s5 + $0x160] sm:$0xff] }
 0x56e   : > { %2649 = vmatpush1.bf16.msra.mxu0 %v5142_v13  ;;  %2692 = vmatpush1.bf16.msra.mxu1 %v5233_v62 }
 0x56f   : > { %2650 = vmatprep.subr.bf16.mxu0 %v5145_v16  ;;  %2693 = vmatprep.subr.bf16.mxu1 %v5237_v63 }
 0x572   : > { %2651 = vmatpush1.bf16.msra.mxu0 %v5148_v17  ;;  %2694 = vmatpush1.bf16.msra.mxu1 %v5241_v0  ;;  %v3972_v17 = vld [vmem:[%s5032_s5 + $0x168] sm:$0xff] }
 0x573   : > { %2992 = vmatprep.subr.bf16.mxu0 %v5171_v39  ;;  %3035 = vmatprep.subr.bf16.mxu1 %v5173_v35 }
 0x615   : > { %v2314_v5 = vpop.f32.mrf.mxu0  ;;  %v2357_v9 = vpop.f32.mrf.mxu1 }
 0x616   : > { %v2366_v7 = vadd.f32 %v3967_v3, %v2314_v5  ;;  %v2368_v55 = vadd.f32 %v3969_v19, %v2357_v9 }
 0x617   : > { %v2316_v10 = vpop.f32.mrf.mxu0  ;;  %v2359_v15 = vpop.f32.mrf.mxu1 }
 0x618   : > { %v4007_v13 = vmul.f32 -1.442695, %v2366_v7  ;;  %v2367_v16 = vadd.f32 %v3968_v6, %v2316_v10  ;;  %v2369_v38 = vadd.f32 %v3970_v28, %v2359_v15 }
 0x619   : > { %v2318_v27 = vpop.f32.mrf.mxu0  ;;  %v2361_v24 = vpop.f32.mrf.mxu1 }
 0x61a   : > { %4571 = vpow2.f32 %v4007_v13  ;;  %v4009_v11 = vmul.f32 -1.442695, %v2367_v16  ;;  %v2370_v39 = vadd.f32 %v3971_v12, %v2318_v27  ;;  %v4011_v42 = vmul.f32 -1.442695, %v2369_v38 }
 0x61b   : > { %v2320_v20 = vpop.f32.mrf.mxu0  ;;  %v2363_v31 = vpop.f32.mrf.mxu1  ;;  %v2372_v8 = vadd.f32 %v3973_v21, %v2361_v24 }
 0x61c   : > { %4573 = vpow2.f32 %v4009_v11  ;;  %v4008_v35 = vmul.f32 -1.442695, %v2370_v39  ;;  %v2371_v23 = vadd.f32 %v3972_v17, %v2320_v20  ;;  %v2373_v2 = vadd.f32 %v3974_v37, %v2363_v31 }
 0x61e   : > { %4575 = vpow2.f32 %v4008_v35  ;;  %v4010_v14 = vmul.f32 -1.442695, %v2371_v23  ;;  %v4012_v25 = vmul.f32 -1.442695, %v2373_v2 }
 0x620   : > { %4577 = vpow2.f32 %v4010_v14 }
 0x621   : > { %4579 = vtanh.f32 %v2368_v55 }
 0x627   : > { %v4572_v40 = vpop.eup %4571 }
 0x628   : > { %v2380_v18 = vadd.f32 1.0, %v4572_v40  ;;  %v4020_v40 = vld [vmem:[%s5032_s5 + $0x198] sm:$0xff] }
 0x629   : > { %v4574_v26 = vpop.eup %4573 }
 0x62a   : > { %4581 = vrcp.f32 %v2380_v18  ;;  %v2392_v41 = vadd.f32 1.0, %v4574_v26  ;;  %v4024_v18 = vld [vmem:[%s5032_s5 + $0x1b8] sm:$0xff] }
 0x62b   : > { %v4576_v29 = vpop.eup %4575  ;;  %4583 = vpow2.f32 %v4011_v42  ;;  %v4019_v42 = vld [vmem:[%s5032_s5 + $0x190] sm:$0xff] }
 0x62c   : > { %4585 = vrcp.f32 %v2392_v41  ;;  %v2381_v32 = vadd.f32 1.0, %v4576_v29 }
 0x62d   : > { %v4578_v33 = vpop.eup %4577  ;;  %4587 = vpow2.f32 %v4012_v25 }
 0x62e   : > { %4589 = vrcp.f32 %v2381_v32  ;;  %v2393_v1 = vadd.f32 1.0, %v4578_v33  ;;  %v4580_v34 = vpop.eup %4579  ;;  %v4023_v33 = vld [vmem:[%s5032_s5 + $0x1b0] sm:$0xff] }
 0x62f   : > { %4591 = vtanh.f32 %v2372_v8 }
 0x630   : > { %4593 = vrcp.f32 %v2393_v1 }
 0x637   : > { %v4582_v22 = vpop.eup %4581 }
 0x638   : > { %v4584_v36 = vpop.eup %4583  ;;  %v2414_v6 = vmul.f32 %v4582_v22, %v4580_v34 }
 0x639   : > { %v4586_v3 = vpop.eup %4585  ;;  %v2406_v10 = vadd.f32 1.0, %v4584_v36 }
 0x63a   : > { %v4588_v5 = vpop.eup %4587  ;;  %v2412_v7 = vmul.f32 %v4586_v3, %v5309_v43 }
 0x63b   : > { %v4590_v9 = vpop.eup %4589  ;;  %v2407_v27 = vadd.f32 1.0, %v4588_v5  ;;  %4595 = vrcp.f32 %v2406_v10 }
 0x63c   : > { %v4592_v12 = vpop.eup %4591  ;;  %v5360_v13 = vadd.f32 %v2414_v6, %v2412_v7 }
 0x63d   : > { %v4594_v16 = vpop.eup %4593  ;;  %v2415_v17 = vmul.f32 %v4592_v12, %v4590_v9 }
 0x63e   : > { %v2413_v11 = vmul.f32 %v4594_v16, %v5312_v30  ;;  %4597 = vtanh.f32 %v5360_v13 }
 0x63f   : > { %4599 = vrcp.f32 %v2407_v27 }
 0x640   : > { %v5363_v15 = vadd.f32 %v2415_v17, %v2413_v11 }
 0x642   : > { %4601 = vtanh.f32 %v5363_v15 }
 0x648   : > { %v4596_v43 = vpop.eup %4595 }
 0x64b   : > { %v4598_v39 = vpop.eup %4597 }
 0x64c   : > { %v4600_v20 = vpop.eup %4599  ;;  %v2420_v23 = vmul.f32 %v4598_v39, %v4596_v43 }
 0x64f   : > { %v4602_v35 = vpop.eup %4601 }
 0x650   : > { %v2421_v24 = vmul.f32 %v4602_v35, %v4600_v20 }
 0x652   : > { %v2422_v14 = vpack.c.bf16 %v2421_v24, %v2420_v23 }
 0x654   : > { %4221 = vst [vmem:[%s4893_s21 + $0x28] sm:$0xff] %v2422_v14   ;;  %2669 = vmatmul.mubr.bf16.vlgmr.msra.gmra.mxu0 %v2422_v14  ;;  %2712 = vmatmul.mubr.bf16.vlgmr.msra.gmra.mxu1 %v2422_v14 }
 0x655   : > { %2993 = vmatpush1.bf16.msra.mxu0 %v5175_v60  ;;  %3036 = vmatpush1.bf16.msra.mxu1 %v5177_v44  ;;  %v4398_v60 = vld [vmem:[#allocation5 + $0x84] ss:$16 sps:$4 sm:$0xff]  }
 0x656   : > { %2994 = vmatprep.subr.bf16.mxu0 %v5183_v45  ;;  %3037 = vmatprep.subr.bf16.mxu1 %v5185_v46  ;;  %v4401_v44 = vld [vmem:[#allocation5 + $0x64] ss:$16 sps:$4 sm:$0xff]   ;;  %v4399_v45 = vld [vmem:[#allocation5 + $0x60] ss:$16 sps:$4 sm:$0xff]  }
 0x657   : > { %3024 = vmatprep.mubr.bf16.mxu0 %v4786_v4  ;;  %3067 = vmatprep.mubr.bf16.mxu1 %v4786_v4  ;;  %v4396_v4 = vld [vmem:[#allocation5 + $0x80] ss:$16 sps:$4 sm:$0xff]   ;;  %v4404_v46 = vld [vmem:[#allocation5 + $0x44] ss:$16 sps:$4 sm:$0xff]  }
 0x659   : > { %2995 = vmatpush1.bf16.msra.mxu0 %v5187_v47  ;;  %3038 = vmatpush1.bf16.msra.mxu1 %v5189_v48  ;;  %v4402_v47 = vld [vmem:[#allocation5 + $0x40] ss:$16 sps:$4 sm:$0xff]   ;;  %v4407_v48 = vld [vmem:[#allocation5 + $0x24] ss:$16 sps:$4 sm:$0xff]  }
 0x65a   : > { %2996 = vmatprep.subr.bf16.mxu0 %v5195_v49  ;;  %3039 = vmatprep.subr.bf16.mxu1 %v5197_v50  ;;  %v4405_v49 = vld [vmem:[#allocation5 + $0x20] ss:$16 sps:$4 sm:$0xff]   ;;  %v4410_v50 = vld [vmem:[#allocation5 + $0x4] ss:$16 sps:$4 sm:$0xff]  }
 0x65d   : > { %2997 = vmatpush1.bf16.msra.mxu0 %v5199_v51  ;;  %3040 = vmatpush1.bf16.msra.mxu1 %v5201_v52  ;;  %v4408_v51 = vld [vmem:[#allocation5] ss:$16 sps:$4 sm:$0xff]   ;;  %v4017_v52 = vld [vmem:[%s5032_s5 + $0x180] sm:$0xff] }
 0x65e   : > { %3041 = vmatprep.subr.bf16.mxu1 %v5209_v54  ;;  %2998 = vmatprep.subr.bf16.mxu0 %v4398_v60  ;;  %v4018_v54 = vld [vmem:[%s5032_s5 + $0x188] sm:$0xff] }
 0x661   : > { %3042 = vmatpush1.bf16.msra.mxu1 %v5207_v53  ;;  %2999 = vmatpush1.bf16.msra.mxu0 %v4396_v4 }
 0x662   : > { %3043 = vmatprep.subr.bf16.mxu1 %v5212_v56  ;;  %3000 = vmatprep.subr.bf16.mxu0 %v4401_v44 }
 0x665   : > { %3044 = vmatpush1.bf16.msra.mxu1 %v5217_v57  ;;  %3001 = vmatpush1.bf16.msra.mxu0 %v4399_v45 }
 0x666   : > { %3045 = vmatprep.subr.bf16.mxu1 %v5221_v58  ;;  %3002 = vmatprep.subr.bf16.mxu0 %v4404_v46 }
 0x669   : > { %3046 = vmatpush1.bf16.msra.mxu1 %v5225_v59  ;;  %3003 = vmatpush1.bf16.msra.mxu0 %v4402_v47  ;;  %v4021_v59 = vld [vmem:[%s5032_s5 + $0x1a0] sm:$0xff] }
 0x66a   : > { %3047 = vmatprep.subr.bf16.mxu1 %v5229_v61  ;;  %3004 = vmatprep.subr.bf16.mxu0 %v4407_v48 }
 0x66d   : > { %3048 = vmatpush1.bf16.msra.mxu1 %v5233_v62  ;;  %3005 = vmatpush1.bf16.msra.mxu0 %v4405_v49 }
 0x66e   : > { %3049 = vmatprep.subr.bf16.mxu1 %v5237_v63  ;;  %3006 = vmatprep.subr.bf16.mxu0 %v4410_v50 }
 0x671   : > { %3050 = vmatpush1.bf16.msra.mxu1 %v5241_v0  ;;  %3007 = vmatpush1.bf16.msra.mxu0 %v4408_v51  ;;  %v4022_v0 = vld [vmem:[%s5032_s5 + $0x1a8] sm:$0xff] }
 0x672   : > { %v4068_v51 = vld [vmem:[%s5032_s5 + $0x1c8] sm:$0xff] }
 0x714   : > { %v2670_v53 = vpop.f32.mrf.mxu0  ;;  %v2713_v57 = vpop.f32.mrf.mxu1 }
 0x715   : > { %v2722_v56 = vadd.f32 %v4017_v52, %v2670_v53  ;;  %v2724_v25 = vadd.f32 %v4019_v42, %v2713_v57 }
 0x716   : > { %v2672_v58 = vpop.f32.mrf.mxu0  ;;  %v2715_v28 = vpop.f32.mrf.mxu1 }
 0x717   : > { %v4057_v61 = vmul.f32 -1.442695, %v2722_v56  ;;  %v2723_v62 = vadd.f32 %v4018_v54, %v2672_v58  ;;  %v2725_v26 = vadd.f32 %v4020_v40, %v2715_v28  ;;  %v4071_v56 = vld [vmem:[%s5032_s5 + $0x1e0] sm:$0xff] }
 0x718   : > { %v2674_v63 = vpop.f32.mrf.mxu0  ;;  %v2717_v55 = vpop.f32.mrf.mxu1 }
 0x719   : > { %4603 = vpow2.f32 %v4057_v61  ;;  %v4059_v30 = vmul.f32 -1.442695, %v2723_v62  ;;  %v2726_v19 = vadd.f32 %v4021_v59, %v2674_v63  ;;  %v4061_v8 = vmul.f32 -1.442695, %v2725_v26  ;;  %v4072_v61 = vld [vmem:[%s5032_s5 + $0x1e8] sm:$0xff] }
 0x71a   : > { %v2676_v37 = vpop.f32.mrf.mxu0  ;;  %v2719_v21 = vpop.f32.mrf.mxu1  ;;  %v2728_v3 = vadd.f32 %v4023_v33, %v2717_v55  ;;  %v4069_v55 = vld [vmem:[%s5032_s5 + $0x1d0] sm:$0xff] }
 0x71b   : > { %4605 = vpow2.f32 %v4059_v30  ;;  %v4058_v31 = vmul.f32 -1.442695, %v2726_v19  ;;  %v2727_v38 = vadd.f32 %v4022_v0, %v2676_v37  ;;  %v2729_v41 = vadd.f32 %v4024_v18, %v2719_v21 }
 0x71d   : > { %4607 = vpow2.f32 %v4058_v31  ;;  %v4060_v2 = vmul.f32 -1.442695, %v2727_v38  ;;  %v4062_v34 = vmul.f32 -1.442695, %v2729_v41  ;;  %v4070_v38 = vld [vmem:[%s5032_s5 + $0x1d8] sm:$0xff] }
 0x71f   : > { %4609 = vpow2.f32 %v4060_v2  ;;  %v4074_v2 = vld [vmem:[%s5032_s5 + $0x1f8] sm:$0xff] }
 0x720   : > { %4611 = vtanh.f32 %v2724_v25 }
 0x726   : > { %v4604_v29 = vpop.eup %4603 }
 0x727   : > { %v2736_v32 = vadd.f32 1.0, %v4604_v29  ;;  %v4073_v29 = vld [vmem:[%s5032_s5 + $0x1f0] sm:$0xff] }
 0x728   : > { %v4606_v1 = vpop.eup %4605 }
 0x729   : > { %4613 = vrcp.f32 %v2736_v32  ;;  %v2748_v22 = vadd.f32 1.0, %v4606_v1 }
 0x72a   : > { %v4608_v36 = vpop.eup %4607  ;;  %4615 = vpow2.f32 %v4061_v8 }
 0x72b   : > { %4617 = vrcp.f32 %v2748_v22  ;;  %v2737_v5 = vadd.f32 1.0, %v4608_v36 }
 0x72c   : > { %v4610_v6 = vpop.eup %4609  ;;  %4619 = vpow2.f32 %v4062_v34 }
 0x72d   : > { %4621 = vrcp.f32 %v2737_v5  ;;  %v2749_v7 = vadd.f32 1.0, %v4610_v6  ;;  %v4612_v9 = vpop.eup %4611 }
 0x72e   : > { %4623 = vtanh.f32 %v2728_v3 }
 0x72f   : > { %4625 = vrcp.f32 %v2749_v7 }
 0x736   : > { %v4614_v10 = vpop.eup %4613 }
 0x737   : > { %v4616_v12 = vpop.eup %4615  ;;  %v2770_v17 = vmul.f32 %v4614_v10, %v4612_v9 }
 0x738   : > { %v4618_v16 = vpop.eup %4617  ;;  %v2762_v39 = vadd.f32 1.0, %v4616_v12 }
 0x739   : > { %v4620_v27 = vpop.eup %4619  ;;  %v2768_v11 = vmul.f32 %v4618_v16, %v5360_v13 }
 0x73a   : > { %v4622_v43 = vpop.eup %4621  ;;  %v2763_v24 = vadd.f32 1.0, %v4620_v27  ;;  %4627 = vrcp.f32 %v2762_v39 }
 0x73b   : > { %v4624_v20 = vpop.eup %4623  ;;  %v5399_v35 = vadd.f32 %v2770_v17, %v2768_v11 }
 0x73c   : > { %v4626_v23 = vpop.eup %4625  ;;  %v2771_v14 = vmul.f32 %v4624_v20, %v4622_v43 }
 0x73d   : > { %v2769_v4 = vmul.f32 %v4626_v23, %v5363_v15  ;;  %4629 = vtanh.f32 %v5399_v35  ;;  %v4067_v15 = vld [vmem:[%s5032_s5 + $0x1c0] sm:$0xff] }
 0x73e   : > { %4631 = vrcp.f32 %v2763_v24 }
 0x73f   : > { %v5402_v60 = vadd.f32 %v2771_v14, %v2769_v4 }
 0x741   : > { %4633 = vtanh.f32 %v5402_v60 }
 0x747   : > { %v4628_v13 = vpop.eup %4627 }
 0x74a   : > { %v4630_v44 = vpop.eup %4629 }
 0x74b   : > { %v4632_v45 = vpop.eup %4631  ;;  %v2776_v47 = vmul.f32 %v4630_v44, %v4628_v13 }
 0x74e   : > { %v4634_v46 = vpop.eup %4633 }
 0x74f   : > { %v2777_v48 = vmul.f32 %v4634_v46, %v4632_v45 }
 0x751   : > { %v2778_v49 = vpack.c.bf16 %v2777_v48, %v2776_v47 }
 0x753   : > { %4222 = vst [vmem:[%s4893_s21 + $0x30] sm:$0xff] %v2778_v49   ;;  %3025 = vmatmul.mubr.bf16.vlgmr.msra.gmra.mxu0 %v2778_v49  ;;  %3068 = vmatmul.mubr.bf16.vlgmr.msra.gmra.mxu1 %v2778_v49 }
 0x813   : > { %v3026_v50 = vpop.f32.mrf.mxu0  ;;  %v3069_v53 = vpop.f32.mrf.mxu1 }
 0x814   : > { %v3078_v52 = vadd.f32 %v4067_v15, %v3026_v50  ;;  %v3080_v18 = vadd.f32 %v4069_v55, %v3069_v53 }
 0x815   : > { %v3028_v54 = vpop.f32.mrf.mxu0  ;;  %v3071_v63 = vpop.f32.mrf.mxu1 }
 0x816   : > { %v4107_v57 = vmul.f32 -1.442695, %v3078_v52  ;;  %v3079_v58 = vadd.f32 %v4068_v51, %v3028_v54  ;;  %v3081_v42 = vadd.f32 %v4070_v38, %v3071_v63 }
 0x817   : > { %v3030_v59 = vpop.f32.mrf.mxu0  ;;  %v3073_v37 = vpop.f32.mrf.mxu1 }
 0x818   : > { %4635 = vpow2.f32 %v4107_v57  ;;  %v4109_v62 = vmul.f32 -1.442695, %v3079_v58  ;;  %v3082_v0 = vadd.f32 %v4071_v56, %v3030_v59  ;;  %v4111_v25 = vmul.f32 -1.442695, %v3081_v42 }
 0x819   : > { %v3032_v30 = vpop.f32.mrf.mxu0  ;;  %v3075_v40 = vpop.f32.mrf.mxu1  ;;  %v3084_v34 = vadd.f32 %v4073_v29, %v3073_v37 }
 0x81a   : > { %4637 = vpow2.f32 %v4109_v62  ;;  %v4108_v28 = vmul.f32 -1.442695, %v3082_v0  ;;  %v3083_v19 = vadd.f32 %v4072_v61, %v3032_v30  ;;  %v3085_v21 = vadd.f32 %v4074_v2, %v3075_v40 }
 0x81c   : > { %4639 = vpow2.f32 %v4108_v28  ;;  %v4110_v31 = vmul.f32 -1.442695, %v3083_v19  ;;  %v4112_v32 = vmul.f32 -1.442695, %v3085_v21 }
 0x81e   : > { %4641 = vpow2.f32 %v4110_v31 }
 0x81f   : > { %4643 = vtanh.f32 %v3080_v18 }
 0x825   : > { %v4636_v26 = vpop.eup %4635 }
 0x826   : > { %v3092_v41 = vadd.f32 1.0, %v4636_v26 }
 0x827   : > { %v4638_v8 = vpop.eup %4637 }
 0x828   : > { %4645 = vrcp.f32 %v3092_v41  ;;  %v3104_v33 = vadd.f32 1.0, %v4638_v8 }
 0x829   : > { %v4640_v1 = vpop.eup %4639  ;;  %4647 = vpow2.f32 %v4111_v25 }
 0x82a   : > { %4649 = vrcp.f32 %v3104_v33  ;;  %v3093_v22 = vadd.f32 1.0, %v4640_v1 }
 0x82b   : > { %v4642_v36 = vpop.eup %4641  ;;  %4651 = vpow2.f32 %v4112_v32 }
 0x82c   : > { %4653 = vrcp.f32 %v3093_v22  ;;  %v3105_v3 = vadd.f32 1.0, %v4642_v36  ;;  %v4644_v5 = vpop.eup %4643 }
 0x82d   : > { %4655 = vtanh.f32 %v3084_v34 }
 0x82e   : > { %4657 = vrcp.f32 %v3105_v3 }
 0x835   : > { %v4646_v6 = vpop.eup %4645 }
 0x836   : > { %v4648_v7 = vpop.eup %4647  ;;  %v3126_v12 = vmul.f32 %v4646_v6, %v4644_v5 }
 0x837   : > { %v4650_v9 = vpop.eup %4649  ;;  %v3118_v17 = vadd.f32 1.0, %v4648_v7 }
 0x838   : > { %v4652_v10 = vpop.eup %4651  ;;  %v3124_v16 = vmul.f32 %v4650_v9, %v5399_v35 }
 0x839   : > { %v4654_v27 = vpop.eup %4653  ;;  %v3119_v20 = vadd.f32 1.0, %v4652_v10  ;;  %4659 = vrcp.f32 %v3118_v17 }
 0x83a   : > { %v4656_v11 = vpop.eup %4655  ;;  %v3128_v43 = vadd.f32 %v3126_v12, %v3124_v16 }
 0x83b   : > { %v4658_v39 = vpop.eup %4657  ;;  %v3127_v23 = vmul.f32 %v4656_v11, %v4654_v27 }
 0x83c   : > { %3147 = vst [vmem:[#allocation3] sm:$0xff] %v3128_v43  ;;  %v3125_v24 = vmul.f32 %v4658_v39, %v5402_v60  ;;  %4661 = vtanh.f32 %v3128_v43 }
 0x83d   : > { %4663 = vrcp.f32 %v3119_v20 }
 0x83e   : > { %v3129_v14 = vadd.f32 %v3127_v23, %v3125_v24 }
 0x840   : > { %4665 = vtanh.f32 %v3129_v14  ;;  %3148 = vst [vmem:[#allocation3 + $0x8] sm:$0xff] %v3129_v14 }
 0x846   : > { %v4660_v4 = vpop.eup %4659 }
 0x849   : > { %v4662_v13 = vpop.eup %4661 }
 0x84a   : > { %v4664_v35 = vpop.eup %4663  ;;  %v3132_v45 = vmul.f32 %v4662_v13, %v4660_v4 }
 0x84d   : > { %v4666_v44 = vpop.eup %4665 }
 0x84e   : > { %v3133_v46 = vmul.f32 %v4666_v44, %v4664_v35 }
 0x850   : > { %v4210_v47 = vpack.c.bf16 %v3133_v46, %v3132_v45 }
 0x852   : > { %4223 = vst [vmem:[%s4893_s21 + $0x38] sm:$0xff] %v4210_v47   ;;  %4216 = vst [vmem:[#allocation2] sm:$0xff] %v4210_v47  }
 0x853 PF: > { %p4117_p0 = scmp.ge.s32.totalorder %s4771_s17, 1 }
 0x854   : > { %s3154_s9 = ssub.s32 (!%p4117_p0), 0, %s4771_s17 }
 0x855   : > { %3152 = sbr.rel (%p4117_p0) target bundleno = 2411 (0x96b), region = 52  ;;  %s4118_s10 = smin.u32 (!%p4117_p0), %s4771_s17, %s3154_s9 }
 0x856   : > { %s3156_s11 = sand.u32 (!%p4117_p0), 1, %s4118_s10  }
 0x857   : > { %s3157_s12 = ssub.s32 (!%p4117_p0), 0, %s3156_s11 }
 0x85a   : > { %v3175_v60 = vld [vmem:[%s5651_s1] sm:$0xff]  ;;  %v3178_v48 = vlaneseq  ;;  %v4787_v49 = vmov 1983009808   ;;  %v4788_v50 = vmov 0   ;;  %vm3281_vm0 = vcmask 1041408   ;;  %v4669_v0 = vld [vmem:[%s4891_s20 + $0x8] sm:$0xff]   ;;  %s5669_s12 = smov (!%p247_p11, %s3157_s12), %s3156_s11 }
 0x85b   : > { %v3241_v15 = vunpack.c.l.s4 %v4787_v49  ;;  %3326 = vmatprep.mubr.bf16.mxu0 %v4788_v50  ;;  %3439 = vmatprep.mubr.bf16.mxu1 %v4788_v50  ;;  %v3239_v53 = vcombine.high %v3175_v60, %v3175_v60  ;;  %v4668_v63 = vld [vmem:[%s4891_s20] sm:$0xff]   ;;  %vm3256_vm1 = vcmask 31744   ;;  %v4670_v30 = vld [vmem:[%s4891_s20 + $0x10] sm:$0xff]   ;;  %v4671_v28 = vld [vmem:[%s4891_s20 + $0x18] sm:$0xff]  }
 0x85c   : > { %v5422_v51 = vshrl.u32 %v3178_v48, 7  ;;  %v4672_v19 = vld [vmem:[%s4891_s20 + $0x20] sm:$0xff]   ;;  %v4673_v37 = vld [vmem:[%s4891_s20 + $0x28] sm:$0xff]   ;;  %v4674_v31 = vld [vmem:[%s4891_s20 + $0x30] sm:$0xff]  }
 0x85d   : > { %v3242_v52 = vunpack.c.0.s8 %v3241_v15  ;;  %v4675_v38 = vld [vmem:[%s4891_s20 + $0x38] sm:$0xff]   ;;  %v3176_v40 = vld [vmem:[%s5653_s3] sm:$0xf]  ;;  %s4170_s20 = sshll.u32 %s5669_s12, 9 }
 0x85e   : > { %v3180_v55 = vsub.s32 0, %v5422_v51  ;;  %v3188_v2 = vsub.s32 2, %v5422_v51  ;;  %v3184_v42 = vsub.s32 1, %v5422_v51  ;;  %v3192_v18 = vsub.s32 3, %v5422_v51  ;;  %s5470_s25 = scalar_lea.vmem [#allocation4], %s4170_s20 }
 0x85f   : > { %v3245_v54 = vsub.s32 %v3242_v52, %v5422_v51 }
 0x860   : > { %v5460_v21 = vrot.slane %v3176_v40, %v3180_v55  ;;  %v5462_v26 = vrot.slane %v3176_v40, %v3188_v2  ;;  %v5464_v25 = vrot.slane %v3176_v40, %v3184_v42  ;;  %v5466_v41 = vrot.slane %v3176_v40, %v3192_v18 }
 0x861   : > { %v3246_v56 = vrot.slane %v3175_v60, %v3245_v54  ;;  %v3253_v57 = vrot.slane %v3239_v53, %v3245_v54 }
 0x863   : > { %v3254_v58 = vcombine.high %v3246_v56, %v3246_v56  ;;  %v3255_v59 = vcombine.high %v3253_v57, %v3253_v57  ;;  %v3283_v61 = vsel %vm3281_vm0, %v3246_v56, 0  ;;  %v3289_v62 = vsel %vm3281_vm0, %v3253_v57, 0 }
 0x865   : > { %4127 = vmatprep.subr.msk.bf16.mxu0 %vm3281_vm0, %v3254_v58  ;;  %4136 = vmatprep.subr.msk.bf16.mxu1 %vm3281_vm0, %v3255_v59 }
 0x866   : > { %3309 = vmatpush1.bf16.msra.mxu0 %v3283_v61  ;;  %3422 = vmatpush1.bf16.msra.mxu1 %v3289_v62 }
 0x869   : > { %4128 = vmatmul.mubr.msk.bf16.vlgmr.msra.gmra.mxu0 %vm3256_vm1, %v4668_v63  ;;  %4137 = vmatmul.mubr.msk.bf16.vlgmr.msra.gmra.mxu1 %vm3256_vm1, %v4668_v63 }
 0x86a   : > { %3336 = vmatprep.mubr.bf16.mxu0 %v4788_v50  ;;  %3449 = vmatprep.mubr.bf16.mxu1 %v4788_v50 }
 0x871   : > { %4129 = vmatmul.mubr.msk.bf16.gmra.mxu0 %vm3256_vm1, %v4669_v0  ;;  %4138 = vmatmul.mubr.msk.bf16.gmra.mxu1 %vm3256_vm1, %v4669_v0 }
 0x872   : > { %3346 = vmatprep.mubr.bf16.mxu0 %v4788_v50  ;;  %3459 = vmatprep.mubr.bf16.mxu1 %v4788_v50 }
 0x879   : > { %4130 = vmatmul.mubr.msk.bf16.gmra.mxu0 %vm3256_vm1, %v4670_v30  ;;  %4139 = vmatmul.mubr.msk.bf16.gmra.mxu1 %vm3256_vm1, %v4670_v30 }
 0x87a   : > { %3356 = vmatprep.mubr.bf16.mxu0 %v4788_v50  ;;  %3469 = vmatprep.mubr.bf16.mxu1 %v4788_v50 }
 0x881   : > { %4131 = vmatmul.mubr.msk.bf16.gmra.mxu0 %vm3256_vm1, %v4671_v28  ;;  %4140 = vmatmul.mubr.msk.bf16.gmra.mxu1 %vm3256_vm1, %v4671_v28 }
 0x882   : > { %3366 = vmatprep.mubr.bf16.mxu0 %v4788_v50  ;;  %3479 = vmatprep.mubr.bf16.mxu1 %v4788_v50 }
 0x889   : > { %4132 = vmatmul.mubr.msk.bf16.gmra.mxu0 %vm3256_vm1, %v4672_v19  ;;  %4141 = vmatmul.mubr.msk.bf16.gmra.mxu1 %vm3256_vm1, %v4672_v19 }
 0x88a   : > { %3376 = vmatprep.mubr.bf16.mxu0 %v4788_v50  ;;  %3489 = vmatprep.mubr.bf16.mxu1 %v4788_v50 }
 0x891   : > { %4133 = vmatmul.mubr.msk.bf16.gmra.mxu0 %vm3256_vm1, %v4673_v37  ;;  %4142 = vmatmul.mubr.msk.bf16.gmra.mxu1 %vm3256_vm1, %v4673_v37 }
 0x892   : > { %3386 = vmatprep.mubr.bf16.mxu0 %v4788_v50  ;;  %3499 = vmatprep.mubr.bf16.mxu1 %v4788_v50 }
 0x899   : > { %4134 = vmatmul.mubr.msk.bf16.gmra.mxu0 %vm3256_vm1, %v4674_v31  ;;  %4143 = vmatmul.mubr.msk.bf16.gmra.mxu1 %vm3256_vm1, %v4674_v31 }
 0x89a   : > { %3396 = vmatprep.mubr.bf16.mxu0 %v4788_v50  ;;  %3509 = vmatprep.mubr.bf16.mxu1 %v4788_v50 }
 0x8a1   : > { %4135 = vmatmul.mubr.msk.bf16.gmra.mxu0 %vm3256_vm1, %v4675_v38  ;;  %4144 = vmatmul.mubr.msk.bf16.gmra.mxu1 %vm3256_vm1, %v4675_v38 }
 0x929   : > { %v3328_v29 = vpop.f32.mrf.mxu0  ;;  %v3441_v8 = vpop.f32.mrf.mxu1 }
 0x92a   : > { %v3329_v32 = vadd.f32 %v3328_v29, %v5460_v21  ;;  %v3442_v33 = vadd.f32 %v3441_v8, %v5462_v26 }
 0x92b   : > { %v3330_v1 = vpop.f32.mrf.mxu0  ;;  %v3443_v34 = vpop.f32.mrf.mxu1 }
 0x92c   : > { %3523 = vst [vmem:[%s5470_s25] sm:$0xff] %v3329_v32  ;;  %3525 = vst [vmem:[%s5470_s25 + $0x10] sm:$0xff] %v3442_v33  ;;  %v3331_v22 = vadd.f32 %v3330_v1, %v5464_v25  ;;  %v3444_v36 = vadd.f32 %v3443_v34, %v5466_v41 }
 0x92d   : > { %v3332_v3 = vpop.f32.mrf.mxu0  ;;  %v3445_v5 = vpop.f32.mrf.mxu1 }
 0x92e   : > { %3524 = vst [vmem:[%s5470_s25 + $0x8] sm:$0xff] %v3331_v22  ;;  %3526 = vst [vmem:[%s5470_s25 + $0x18] sm:$0xff] %v3444_v36  ;;  %v3333_v6 = vadd.f32 %v3332_v3, %v5460_v21  ;;  %v3446_v7 = vadd.f32 %v3445_v5, %v5462_v26 }
 0x92f   : > { %v3334_v9 = vpop.f32.mrf.mxu0  ;;  %v3447_v10 = vpop.f32.mrf.mxu1 }
 0x930   : > { %3527 = vst [vmem:[%s5470_s25 + $0x20] sm:$0xff] %v3333_v6  ;;  %3529 = vst [vmem:[%s5470_s25 + $0x30] sm:$0xff] %v3446_v7  ;;  %v3335_v12 = vadd.f32 %v3334_v9, %v5464_v25  ;;  %v3448_v16 = vadd.f32 %v3447_v10, %v5466_v41 }
 0x931   : > { %v3338_v27 = vpop.f32.mrf.mxu0  ;;  %v3451_v17 = vpop.f32.mrf.mxu1 }
 0x932   : > { %3528 = vst [vmem:[%s5470_s25 + $0x28] sm:$0xff] %v3335_v12  ;;  %3530 = vst [vmem:[%s5470_s25 + $0x38] sm:$0xff] %v3448_v16  ;;  %v3339_v11 = vadd.f32 %v3338_v27, %v5460_v21  ;;  %v3452_v43 = vadd.f32 %v3451_v17, %v5462_v26 }
 0x933   : > { %v3340_v39 = vpop.f32.mrf.mxu0  ;;  %v3453_v20 = vpop.f32.mrf.mxu1 }
 0x934   : > { %3531 = vst [vmem:[%s5470_s25 + $0x40] sm:$0xff] %v3339_v11  ;;  %3533 = vst [vmem:[%s5470_s25 + $0x50] sm:$0xff] %v3452_v43  ;;  %v3341_v23 = vadd.f32 %v3340_v39, %v5464_v25  ;;  %v3454_v24 = vadd.f32 %v3453_v20, %v5466_v41 }
 0x935   : > { %v3342_v14 = vpop.f32.mrf.mxu0  ;;  %v3455_v4 = vpop.f32.mrf.mxu1 }
 0x936   : > { %3532 = vst [vmem:[%s5470_s25 + $0x48] sm:$0xff] %v3341_v23  ;;  %3534 = vst [vmem:[%s5470_s25 + $0x58] sm:$0xff] %v3454_v24  ;;  %v3343_v13 = vadd.f32 %v3342_v14, %v5460_v21  ;;  %v3456_v35 = vadd.f32 %v3455_v4, %v5462_v26 }
 0x937   : > { %v3344_v44 = vpop.f32.mrf.mxu0  ;;  %v3457_v45 = vpop.f32.mrf.mxu1 }
 0x938   : > { %3535 = vst [vmem:[%s5470_s25 + $0x60] sm:$0xff] %v3343_v13  ;;  %3537 = vst [vmem:[%s5470_s25 + $0x70] sm:$0xff] %v3456_v35  ;;  %v3345_v46 = vadd.f32 %v3344_v44, %v5464_v25  ;;  %v3458_v47 = vadd.f32 %v3457_v45, %v5466_v41 }
 0x939   : > { %v3348_v60 = vpop.f32.mrf.mxu0  ;;  %v3461_v48 = vpop.f32.mrf.mxu1 }
 0x93a   : > { %3536 = vst [vmem:[%s5470_s25 + $0x68] sm:$0xff] %v3345_v46  ;;  %3538 = vst [vmem:[%s5470_s25 + $0x78] sm:$0xff] %v3458_v47  ;;  %v3349_v49 = vadd.f32 %v3348_v60, %v5460_v21  ;;  %v3462_v15 = vadd.f32 %v3461_v48, %v5462_v26 }
 0x93b   : > { %v3350_v50 = vpop.f32.mrf.mxu0  ;;  %v3463_v51 = vpop.f32.mrf.mxu1 }
 0x93c   : > { %3539 = vst [vmem:[%s5470_s25 + $0x80] sm:$0xff] %v3349_v49  ;;  %3541 = vst [vmem:[%s5470_s25 + $0x90] sm:$0xff] %v3462_v15  ;;  %v3351_v52 = vadd.f32 %v3350_v50, %v5464_v25  ;;  %v3464_v53 = vadd.f32 %v3463_v51, %v5466_v41 }
 0x93d   : > { %v3352_v54 = vpop.f32.mrf.mxu0  ;;  %v3465_v56 = vpop.f32.mrf.mxu1 }
 0x93e   : > { %3540 = vst [vmem:[%s5470_s25 + $0x88] sm:$0xff] %v3351_v52  ;;  %3542 = vst [vmem:[%s5470_s25 + $0x98] sm:$0xff] %v3464_v53  ;;  %v3353_v57 = vadd.f32 %v3352_v54, %v5460_v21  ;;  %v3466_v58 = vadd.f32 %v3465_v56, %v5462_v26 }
 0x93f   : > { %v3354_v59 = vpop.f32.mrf.mxu0  ;;  %v3467_v61 = vpop.f32.mrf.mxu1 }
 0x940   : > { %3543 = vst [vmem:[%s5470_s25 + $0xa0] sm:$0xff] %v3353_v57  ;;  %3545 = vst [vmem:[%s5470_s25 + $0xb0] sm:$0xff] %v3466_v58  ;;  %v3355_v62 = vadd.f32 %v3354_v59, %v5464_v25  ;;  %v3468_v63 = vadd.f32 %v3467_v61, %v5466_v41 }
 0x941   : > { %v3358_v0 = vpop.f32.mrf.mxu0  ;;  %v3471_v30 = vpop.f32.mrf.mxu1 }
 0x942   : > { %3544 = vst [vmem:[%s5470_s25 + $0xa8] sm:$0xff] %v3355_v62  ;;  %3546 = vst [vmem:[%s5470_s25 + $0xb8] sm:$0xff] %v3468_v63  ;;  %v3359_v28 = vadd.f32 %v3358_v0, %v5460_v21  ;;  %v3472_v19 = vadd.f32 %v3471_v30, %v5462_v26 }
 0x943   : > { %v3360_v37 = vpop.f32.mrf.mxu0  ;;  %v3473_v31 = vpop.f32.mrf.mxu1 }
 0x944   : > { %3547 = vst [vmem:[%s5470_s25 + $0xc0] sm:$0xff] %v3359_v28  ;;  %3549 = vst [vmem:[%s5470_s25 + $0xd0] sm:$0xff] %v3472_v19  ;;  %v3361_v38 = vadd.f32 %v3360_v37, %v5464_v25  ;;  %v3474_v55 = vadd.f32 %v3473_v31, %v5466_v41 }
 0x945   : > { %v3362_v2 = vpop.f32.mrf.mxu0  ;;  %v3475_v40 = vpop.f32.mrf.mxu1 }
 0x946   : > { %3548 = vst [vmem:[%s5470_s25 + $0xc8] sm:$0xff] %v3361_v38  ;;  %3550 = vst [vmem:[%s5470_s25 + $0xd8] sm:$0xff] %v3474_v55  ;;  %v3363_v42 = vadd.f32 %v3362_v2, %v5460_v21  ;;  %v3476_v18 = vadd.f32 %v3475_v40, %v5462_v26 }
 0x947   : > { %v3364_v29 = vpop.f32.mrf.mxu0  ;;  %v3477_v8 = vpop.f32.mrf.mxu1 }
 0x948   : > { %3551 = vst [vmem:[%s5470_s25 + $0xe0] sm:$0xff] %v3363_v42  ;;  %3553 = vst [vmem:[%s5470_s25 + $0xf0] sm:$0xff] %v3476_v18  ;;  %v3365_v32 = vadd.f32 %v3364_v29, %v5464_v25  ;;  %v3478_v33 = vadd.f32 %v3477_v8, %v5466_v41 }
 0x949   : > { %v3368_v1 = vpop.f32.mrf.mxu0  ;;  %v3481_v34 = vpop.f32.mrf.mxu1 }
 0x94a   : > { %3552 = vst [vmem:[%s5470_s25 + $0xe8] sm:$0xff] %v3365_v32  ;;  %3554 = vst [vmem:[%s5470_s25 + $0xf8] sm:$0xff] %v3478_v33  ;;  %v3369_v22 = vadd.f32 %v3368_v1, %v5460_v21  ;;  %v3482_v36 = vadd.f32 %v3481_v34, %v5462_v26 }
 0x94b   : > { %v3370_v3 = vpop.f32.mrf.mxu0  ;;  %v3483_v5 = vpop.f32.mrf.mxu1 }
 0x94c   : > { %3555 = vst [vmem:[%s5470_s25 + $0x100] sm:$0xff] %v3369_v22  ;;  %3557 = vst [vmem:[%s5470_s25 + $0x110] sm:$0xff] %v3482_v36  ;;  %v3371_v6 = vadd.f32 %v3370_v3, %v5464_v25  ;;  %v3484_v7 = vadd.f32 %v3483_v5, %v5466_v41 }
 0x94d   : > { %v3372_v9 = vpop.f32.mrf.mxu0  ;;  %v3485_v10 = vpop.f32.mrf.mxu1 }
 0x94e   : > { %3556 = vst [vmem:[%s5470_s25 + $0x108] sm:$0xff] %v3371_v6  ;;  %3558 = vst [vmem:[%s5470_s25 + $0x118] sm:$0xff] %v3484_v7  ;;  %v3373_v12 = vadd.f32 %v3372_v9, %v5460_v21  ;;  %v3486_v16 = vadd.f32 %v3485_v10, %v5462_v26 }
 0x94f   : > { %v3374_v27 = vpop.f32.mrf.mxu0  ;;  %v3487_v17 = vpop.f32.mrf.mxu1 }
 0x950   : > { %3559 = vst [vmem:[%s5470_s25 + $0x120] sm:$0xff] %v3373_v12  ;;  %3561 = vst [vmem:[%s5470_s25 + $0x130] sm:$0xff] %v3486_v16  ;;  %v3375_v11 = vadd.f32 %v3374_v27, %v5464_v25  ;;  %v3488_v43 = vadd.f32 %v3487_v17, %v5466_v41 }
 0x951   : > { %v3378_v39 = vpop.f32.mrf.mxu0  ;;  %v3491_v20 = vpop.f32.mrf.mxu1 }
 0x952   : > { %3560 = vst [vmem:[%s5470_s25 + $0x128] sm:$0xff] %v3375_v11  ;;  %3562 = vst [vmem:[%s5470_s25 + $0x138] sm:$0xff] %v3488_v43  ;;  %v3379_v23 = vadd.f32 %v3378_v39, %v5460_v21  ;;  %v3492_v24 = vadd.f32 %v3491_v20, %v5462_v26 }
 0x953   : > { %v3380_v14 = vpop.f32.mrf.mxu0  ;;  %v3493_v4 = vpop.f32.mrf.mxu1 }
 0x954   : > { %3563 = vst [vmem:[%s5470_s25 + $0x140] sm:$0xff] %v3379_v23  ;;  %3565 = vst [vmem:[%s5470_s25 + $0x150] sm:$0xff] %v3492_v24  ;;  %v3381_v13 = vadd.f32 %v3380_v14, %v5464_v25  ;;  %v3494_v35 = vadd.f32 %v3493_v4, %v5466_v41 }
 0x955   : > { %v3382_v44 = vpop.f32.mrf.mxu0  ;;  %v3495_v45 = vpop.f32.mrf.mxu1 }
 0x956   : > { %3564 = vst [vmem:[%s5470_s25 + $0x148] sm:$0xff] %v3381_v13  ;;  %3566 = vst [vmem:[%s5470_s25 + $0x158] sm:$0xff] %v3494_v35  ;;  %v3383_v46 = vadd.f32 %v3382_v44, %v5460_v21  ;;  %v3496_v47 = vadd.f32 %v3495_v45, %v5462_v26 }
 0x957   : > { %v3384_v60 = vpop.f32.mrf.mxu0  ;;  %v3497_v48 = vpop.f32.mrf.mxu1 }
 0x958   : > { %3567 = vst [vmem:[%s5470_s25 + $0x160] sm:$0xff] %v3383_v46  ;;  %3569 = vst [vmem:[%s5470_s25 + $0x170] sm:$0xff] %v3496_v47  ;;  %v3385_v49 = vadd.f32 %v3384_v60, %v5464_v25  ;;  %v3498_v15 = vadd.f32 %v3497_v48, %v5466_v41 }
 0x959   : > { %v3388_v50 = vpop.f32.mrf.mxu0  ;;  %v3501_v51 = vpop.f32.mrf.mxu1 }
 0x95a   : > { %3568 = vst [vmem:[%s5470_s25 + $0x168] sm:$0xff] %v3385_v49  ;;  %3570 = vst [vmem:[%s5470_s25 + $0x178] sm:$0xff] %v3498_v15  ;;  %v3389_v52 = vadd.f32 %v3388_v50, %v5460_v21  ;;  %v3502_v53 = vadd.f32 %v3501_v51, %v5462_v26 }
 0x95b   : > { %v3390_v54 = vpop.f32.mrf.mxu0  ;;  %v3503_v56 = vpop.f32.mrf.mxu1 }
 0x95c   : > { %3571 = vst [vmem:[%s5470_s25 + $0x180] sm:$0xff] %v3389_v52  ;;  %3573 = vst [vmem:[%s5470_s25 + $0x190] sm:$0xff] %v3502_v53  ;;  %v3391_v57 = vadd.f32 %v3390_v54, %v5464_v25  ;;  %v3504_v58 = vadd.f32 %v3503_v56, %v5466_v41 }
 0x95d   : > { %v3392_v59 = vpop.f32.mrf.mxu0  ;;  %v3505_v61 = vpop.f32.mrf.mxu1 }
 0x95e   : > { %3572 = vst [vmem:[%s5470_s25 + $0x188] sm:$0xff] %v3391_v57  ;;  %3574 = vst [vmem:[%s5470_s25 + $0x198] sm:$0xff] %v3504_v58  ;;  %v3393_v62 = vadd.f32 %v3392_v59, %v5460_v21  ;;  %v3506_v63 = vadd.f32 %v3505_v61, %v5462_v26 }
 0x95f   : > { %v3394_v0 = vpop.f32.mrf.mxu0  ;;  %v3507_v30 = vpop.f32.mrf.mxu1 }
 0x960   : > { %3575 = vst [vmem:[%s5470_s25 + $0x1a0] sm:$0xff] %v3393_v62  ;;  %3577 = vst [vmem:[%s5470_s25 + $0x1b0] sm:$0xff] %v3506_v63  ;;  %v3395_v28 = vadd.f32 %v3394_v0, %v5464_v25  ;;  %v3508_v19 = vadd.f32 %v3507_v30, %v5466_v41 }
 0x961   : > { %v3398_v37 = vpop.f32.mrf.mxu0  ;;  %v3511_v31 = vpop.f32.mrf.mxu1 }
 0x962   : > { %3576 = vst [vmem:[%s5470_s25 + $0x1a8] sm:$0xff] %v3395_v28  ;;  %3578 = vst [vmem:[%s5470_s25 + $0x1b8] sm:$0xff] %v3508_v19  ;;  %v3399_v38 = vadd.f32 %v3398_v37, %v5460_v21  ;;  %v3512_v55 = vadd.f32 %v3511_v31, %v5462_v26 }
 0x963   : > { %v3400_v2 = vpop.f32.mrf.mxu0  ;;  %v3513_v40 = vpop.f32.mrf.mxu1 }
 0x964   : > { %3579 = vst [vmem:[%s5470_s25 + $0x1c0] sm:$0xff] %v3399_v38  ;;  %3581 = vst [vmem:[%s5470_s25 + $0x1d0] sm:$0xff] %v3512_v55  ;;  %v3401_v42 = vadd.f32 %v3400_v2, %v5464_v25  ;;  %v3514_v18 = vadd.f32 %v3513_v40, %v5466_v41 }
 0x965   : > { %v3402_v29 = vpop.f32.mrf.mxu0  ;;  %v3515_v8 = vpop.f32.mrf.mxu1 }
 0x966   : > { %3580 = vst [vmem:[%s5470_s25 + $0x1c8] sm:$0xff] %v3401_v42  ;;  %3582 = vst [vmem:[%s5470_s25 + $0x1d8] sm:$0xff] %v3514_v18  ;;  %v3403_v32 = vadd.f32 %v3402_v29, %v5460_v21  ;;  %v3516_v33 = vadd.f32 %v3515_v8, %v5462_v26 }
 0x967   : > { %v3404_v1 = vpop.f32.mrf.mxu0  ;;  %v3517_v34 = vpop.f32.mrf.mxu1 }
 0x968   : > { %3583 = vst [vmem:[%s5470_s25 + $0x1e0] sm:$0xff] %v3403_v32  ;;  %3585 = vst [vmem:[%s5470_s25 + $0x1f0] sm:$0xff] %v3516_v33  ;;  %v3405_v22 = vadd.f32 %v3404_v1, %v5464_v25  ;;  %v3518_v36 = vadd.f32 %v3517_v34, %v5466_v41 }
 0x96a   : > { %3584 = vst [vmem:[%s5470_s25 + $0x1e8] sm:$0xff] %v3405_v22  ;;  %3586 = vst [vmem:[%s5470_s25 + $0x1f8] sm:$0xff] %v3518_v36 }
 0x96b PF: > { %s4148_s26 = sadd.s32 4294967295, %s4771_s17  ;;  %s3606_s27 = sshll.u32 %s4893_s21, 4  ;;  %s5600_s27 = int_to_ptr.vmem [resolvable:$true] %s3606_s27 }
 0x96c   : > { %p3596_p1 = scmp.gt.s32.totalorder %s4148_s26, 0  ;;  %s5609_s6 = scalar_lea.sflag [#allocation7], %s244_s8 }
 0x96d   : > { %s4702_s7 = scalar_lea.vmem %s5600_s27, 1024  ;;  %s4789_s17 = smov [#allocation8]  }
 0x96e   : > { %s5671_s26 = smov (!%p3596_p1, %s4148_s26), 0  ;;  %p4703_p2 = scmp.ne.s32.totalorder %s5600_s27, %s4702_s7 }
 0x96f   : > { %s4171_s28 = sshll.u32 %s5671_s26, 10  ;;  %s4706_s21 = sshll.u32 %s4789_s17, 4  ;;  %s4707_s21 = int_to_ptr.vmem [resolvable:$false] %s4706_s21 }
 0x970   : > { %s5605_s5 = scalar_lea.hbm %s5654_s4, %s4171_s28  ;;  %p4704_p3 = pnand %p4703_p2, %p4850_p4 }
 0x971   : > { %s4708_s9 = scalar_lea.vmem %s4707_s21, 2048  ;;  %p4709_p7 = scmp.lt.s32.totalorder %s5600_s27, %s4707_s21 }
 0x972   : > { %p4705_p5 = pneg %p4704_p3  ;;  %p4710_p8 = scmp.lt.s32.totalorder %s4708_s9, %s4702_s7 }
 0x974   : > { %p4711_p11 = por %p4710_p8, %p4709_p7 }
 0x976   : > { %p4712_p12 = pnand %p4711_p11, %p4705_p5 }
 0x978   : > { %4715 = shalt.err (!%p4712_p12)
}
 0x979   : > { %s4716_s8 = scalar_lea.hbm %s5605_s5, 1024  ;;  %s4720_s12 = scalar_lea.hbm %s5654_s4, 1024 }
 0x97a   : > { %p4717_p9 = scmp.ne.s32.totalorder %s5605_s5, %s4716_s8  ;;  %p4721_p0 = scmp.lt.s32.totalorder %s5605_s5, %s5654_s4 }
 0x97b   : > { %p4722_p1 = scmp.lt.s32.totalorder %s4720_s12, %s4716_s8 }
 0x97c   : > { %p4718_p10 = pnand %p4717_p9, %p4850_p4 }
 0x97d   : > { %p4723_p2 = por %p4722_p1, %p4721_p0 }
 0x97e   : > { %p4719_p13 = pneg %p4718_p10 }
 0x980   : > { %p4724_p3 = pnand %p4723_p2, %p4719_p13 }
 0x982   : > { %4727 = shalt.err (!%p4724_p3)
}
 0x983   : > { %s4790_s20 = smov 64   ;;  %s4791_s25 = smov 4  }
 0x984   : > { %4228 = dma.vmem_to_hbm [thread:$0]  (%p4850_p4), %s5600_s27, 1024, %s5605_s5, %s5609_s6, %s4790_s20, %s4790_s20, %s4791_s25  }
 0x985 PF: > { %p4240_p5 = scmp.ge.s32.totalorder %s4779_s19, 2  ;;  %s3621_s26 = sand.u32 1, %s4763_s15  }
 0x986   : > { %s3622_s28 = scalar_lea.sflag [#allocation7], %s3621_s26 }
 0x987   : > { %p4235_p7 = pnand %p4240_p5, %p4854_p6 }
 0x989   : > { %p4236_p8 = pneg %p4235_p7 }
 0x98b   : > { %4757 = dma.done.wait (%p4236_p8), %s3622_s28, 1024  }
 0x98c   : > { %4759 = vsyncadd (%p4236_p8), %s3622_s28, 4294966272  ;;  %s18_s19 = sadd.s32 1, %s4779_s19   ;;  %s5659_s15 = smov %s4767_s16 }
 0x98d   : > { %p15_p11 = scmp.ge.s32.totalorder %s18_s19, 4   ;;  %s5640_s16 = smov 0  }
 0x98e   : > { %s5660_s17 = smov %s4775_s18  ;;  %s5661_s18 = smov %s5663_s22 }
 0x98f   :  { %17 = sbr.rel (!%p15_p11) target bundleno = 5 (0x5), region = 105 }
 0x994   :  { %3627 = vsyncpa [#allocation6], 1 }
 0x995   :  { %3629 = vsyncpa [#allocation6 + $0x1], 1 }
 0x996   :  { %3630 = vsyncpa [#allocation7], 1 }
 0x997   :  { %3632 = vsyncpa [#allocation7 + $0x1], 1 }

</bundles_post_ra>
